<compile_context>
chip_gen: v7x
topology: tpu7x:2x2x1
jax: 0.10.0
libtpu: 0.0.40
codegen_flags: <defaults>
</compile_context>

<pallas_src>
import jax
import jax.numpy as jnp
from jax.experimental import pallas as pl
from jax.experimental.pallas import tpu as pltpu


TCHUNK = 8                       # timesteps processed per grid iteration
SUBLANE = 8                      # f32 sublane count; batch is padded to a multiple of this
VMEM_LIMIT = 48 * 1024 * 1024    # explicit scoped-VMEM budget (tune per generation)


def _round_up(x, m):
    return ((x + m - 1) // m) * m


def _pick_bblock(b_pad):
    # Two batch blocks when possible (feeds both v7x TensorCores via the "parallel"
    # batch grid axis); each block must be a multiple of 16 sublanes so bf16 context
    # blocks stay tile-aligned.  At small batch: a single full-batch block.
    if b_pad >= 32 and (b_pad // 2) % 16 == 0:
        return b_pad // 2
    return b_pad


# ----------------------------------------------------------------------------
# Encoder kernel: time-chunked LSTM over src.
# Input projection (emb @ W_x + b) is precomputed in the wrapper; only h @ W_h
# remains on the recurrent (serial) path.
# ----------------------------------------------------------------------------
def _make_encoder_kernel(s_real, tchunk, hidden):
    need_mask = (s_real % tchunk) != 0
    H = hidden

    def kernel(xp_ref, wh_ref, ctx_ref, hT_ref, cT_ref, h_sc, c_sc):
        t = pl.program_id(1)

        @pl.when(t == 0)
        def _():
            h_sc[...] = jnp.zeros_like(h_sc)
            c_sc[...] = jnp.zeros_like(c_sc)

        wh = wh_ref[...]                         # (H, 4H) bf16, loaded once per chunk

        for i in range(tchunk):
            h = h_sc[...]
            c = c_sc[...]

            # Serial path: precomputed x-projection + ONE (B,H)x(H,4H) matmul.
            pre = xp_ref[i] + jnp.dot(h.astype(jnp.bfloat16), wh,
                                      preferred_element_type=jnp.float32)

            i_g = jax.nn.sigmoid(pre[:, 0 * H:1 * H])
            f_g = jax.nn.sigmoid(pre[:, 1 * H:2 * H])
            g_g = jnp.tanh(pre[:, 2 * H:3 * H])
            o_g = jax.nn.sigmoid(pre[:, 3 * H:4 * H])

            c_new = f_g * c + i_g * g_g
            h_new = o_g * jnp.tanh(c_new)

            if need_mask:  # keep state frozen on padded timesteps
                valid = (t * tchunk + i) < s_real
                h_new = jnp.where(valid, h_new, h)
                c_new = jnp.where(valid, c_new, c)

            h_sc[...] = h_new
            c_sc[...] = c_new
            # Time-major, lane-dense (B, H) store in bf16 (no sublane masking).
            ctx_ref[i] = h_new.astype(ctx_ref.dtype)

        @pl.when(t == pl.num_programs(1) - 1)
        def _():
            hT_ref[...] = h_sc[...]
            cT_ref[...] = c_sc[...]

    return kernel


def encoder_forward(p, src):
    """src: (S, B) int32 -> ((h_T, c_T) each (B_pad,H), context (B_pad, S, H) bf16)."""
    S, B = src.shape
    E, H = p["emb_dim"], p["hidden"]
    B_pad = _round_up(B, SUBLANE)
    bblock = _pick_bblock(B_pad)
    S_pad = _round_up(S, TCHUNK)

    src_p = jnp.zeros((S_pad, B_pad), jnp.int32).at[:S, :B].set(src)
    emb = jnp.take(p["enc_emb"], src_p, axis=0).astype(jnp.bfloat16)   # (S_pad,B_pad,E)

    # Hoisted input projection: one big (S*B, E)x(E,4H) matmul, bias folded in (XLA).
    x_pre = jnp.einsum('sbe,ef->sbf', emb, p["enc_wx"],
                       preferred_element_type=jnp.float32) + p["enc_b"]  # (S_pad,B_pad,4H)

    out_shape = (
        jax.ShapeDtypeStruct((S_pad, B_pad, H), jnp.bfloat16),  # context, time-major bf16
        jax.ShapeDtypeStruct((B_pad, H), jnp.float32),          # h_T
        jax.ShapeDtypeStruct((B_pad, H), jnp.float32),          # c_T
    )
    grid_spec = pltpu.PrefetchScalarGridSpec(
        num_scalar_prefetch=0,
        grid=(B_pad // bblock, S_pad // TCHUNK),
        in_specs=[
            pl.BlockSpec((TCHUNK, bblock, 4 * H), lambda b, c: (c, b, 0)),
            pl.BlockSpec((H, 4 * H), lambda b, c: (0, 0)),
        ],
        out_specs=[
            pl.BlockSpec((TCHUNK, bblock, H), lambda b, c: (c, b, 0)),
            pl.BlockSpec((bblock, H), lambda b, c: (b, 0)),
            pl.BlockSpec((bblock, H), lambda b, c: (b, 0)),
        ],
        scratch_shapes=[pltpu.VMEM((bblock, H), jnp.float32),
                        pltpu.VMEM((bblock, H), jnp.float32)],
    )
    ctx_tm, hT, cT = pl.pallas_call(
        _make_encoder_kernel(S, TCHUNK, H),
        out_shape=out_shape,
        grid_spec=grid_spec,
        compiler_params=pltpu.CompilerParams(
            dimension_semantics=("parallel", "arbitrary"),
            vmem_limit_bytes=VMEM_LIMIT),
    )(x_pre, p["enc_wh"])

    # One-time XLA transpose off the serial path: (S,B,H) -> (B,S,H) for attention.
    context = jnp.transpose(ctx_tm[:S], (1, 0, 2))   # (B_pad, S, H) bf16
    return (hT, cT), context


# ----------------------------------------------------------------------------
# Decoder kernel: time-chunked input-feed LSTM cell + GlobalAttention ("general").
# Input projection precomputed; no concats on the serial path; attention query is
# projected per step (no full ctx@W_in^T resident block); attn weights not emitted.
# ----------------------------------------------------------------------------
def _make_decoder_kernel(t_real, tchunk, hidden):
    need_mask = (t_real % tchunk) != 0
    H = hidden

    def kernel(xp_ref, ctx_ref, h0_ref, c0_ref,
               wf_ref, wh_ref, win_ref, woc_ref, woh_ref,
               out_ref, hF_ref, cF_ref,
               h_sc, c_sc, o_sc):
        t = pl.program_id(1)

        @pl.when(t == 0)
        def _():
            h_sc[...] = h0_ref[...]
            c_sc[...] = c0_ref[...]
            o_sc[...] = jnp.zeros_like(o_sc)   # make_init_decoder_output: zeros(B, H)

        ctx = ctx_ref[...]                     # (B, S, H) bf16
        wf = wf_ref[...]                       # (H, 4H) bf16
        wh = wh_ref[...]                       # (H, 4H) bf16
        win = win_ref[...]                     # (H, H)  bf16
        woc = woc_ref[...]                     # (H, H)  bf16
        woh = woh_ref[...]                     # (H, H)  bf16

        for i in range(tchunk):
            h = h_sc[...]
            c = c_sc[...]
            feed = o_sc[...]                   # input-feed of previous attn output

            # Input-feed LSTM cell: precomputed x_pre + feed@W_f + h@W_h (no concat).
            pre = (xp_ref[i]
                   + jnp.dot(feed.astype(jnp.bfloat16), wf,
                             preferred_element_type=jnp.float32)
                   + jnp.dot(h.astype(jnp.bfloat16), wh,
                             preferred_element_type=jnp.float32))

            i_g = jax.nn.sigmoid(pre[:, 0 * H:1 * H])
            f_g = jax.nn.sigmoid(pre[:, 1 * H:2 * H])
            g_g = jnp.tanh(pre[:, 2 * H:3 * H])
            o_g = jax.nn.sigmoid(pre[:, 3 * H:4 * H])
            c_new = f_g * c + i_g * g_g
            h_new = o_g * jnp.tanh(c_new)

            # GlobalAttention "general": q = h_t @ W_in ; score_{b,s} = q_b . ctx_{b,s}
            hb = h_new.astype(jnp.bfloat16)
            q = jnp.dot(hb, win, preferred_element_type=jnp.float32)        # (B, H)
            q3 = q[:, None, :].astype(jnp.bfloat16)                          # (B,1,H)
            s3 = jnp.einsum('bqh,bsh->bqs', q3, ctx,
                            preferred_element_type=jnp.float32)              # (B,1,S)
            m = jnp.max(s3, axis=-1, keepdims=True)
            e = jnp.exp(s3 - m)
            denom = jnp.sum(e, axis=-1, keepdims=True)
            p3 = e * pl.reciprocal(denom, approx=True)                       # (B,1,S)
            wctx = jnp.einsum('bqs,bsh->bqh', p3.astype(jnp.bfloat16), ctx,
                              preferred_element_type=jnp.float32)[:, 0, :]   # (B, H)

            # linear_out([wctx; h_t]) -> tanh, as two accumulating matmuls (no concat).
            out_t = jnp.tanh(
                jnp.dot(wctx.astype(jnp.bfloat16), woc,
                        preferred_element_type=jnp.float32)
                + jnp.dot(hb, woh, preferred_element_type=jnp.float32))

            if need_mask:  # freeze state on padded timesteps
                valid = (t * tchunk + i) < t_real
                h_new = jnp.where(valid, h_new, h)
                c_new = jnp.where(valid, c_new, c)
                out_t = jnp.where(valid, out_t, feed)

            h_sc[...] = h_new
            c_sc[...] = c_new
            o_sc[...] = out_t
            out_ref[i] = out_t                 # time-major, lane-dense (B, H) store

        @pl.when(t == pl.num_programs(1) - 1)
        def _():
            hF_ref[...] = h_sc[...]
            cF_ref[...] = c_sc[...]

    return kernel


def decoder_forward(p, tgt, enc_hidden, context):
    """tgt: (T, B) int32, context: (B_pad, S, H) bf16 -> (out (T,B,H), (h,c), None)."""
    T, B = tgt.shape
    E, H = p["emb_dim"], p["hidden"]
    B_pad, S, _ = context.shape
    bblock = _pick_bblock(B_pad)
    T_pad = _round_up(T, TCHUNK)

    tgt_p = jnp.zeros((T_pad, B_pad), jnp.int32).at[:T, :B].set(tgt)
    emb = jnp.take(p["dec_emb"], tgt_p, axis=0).astype(jnp.bfloat16)   # (T_pad,B_pad,E)

    # Hoisted input projection: one big matmul in XLA, bias folded in.
    x_pre = jnp.einsum('tbe,ef->tbf', emb, p["dec_wx"],
                       preferred_element_type=jnp.float32) + p["dec_b"]  # (T_pad,B_pad,4H)

    h0, c0 = enc_hidden                        # (B_pad, H) f32 each

    out_shape = (
        jax.ShapeDtypeStruct((T_pad, B_pad, H), jnp.float32),   # decoder outputs
        jax.ShapeDtypeStruct((B_pad, H), jnp.float32),          # final h
        jax.ShapeDtypeStruct((B_pad, H), jnp.float32),          # final c
    )
    grid_spec = pltpu.PrefetchScalarGridSpec(
        num_scalar_prefetch=0,
        grid=(B_pad // bblock, T_pad // TCHUNK),
        in_specs=[
            pl.BlockSpec((TCHUNK, bblock, 4 * H), lambda b, c: (c, b, 0)),
            pl.BlockSpec((bblock, S, H), lambda b, c: (b, 0, 0)),
            pl.BlockSpec((bblock, H), lambda b, c: (b, 0)),
            pl.BlockSpec((bblock, H), lambda b, c: (b, 0)),
            pl.BlockSpec((H, 4 * H), lambda b, c: (0, 0)),
            pl.BlockSpec((H, 4 * H), lambda b, c: (0, 0)),
            pl.BlockSpec((H, H), lambda b, c: (0, 0)),
            pl.BlockSpec((H, H), lambda b, c: (0, 0)),
            pl.BlockSpec((H, H), lambda b, c: (0, 0)),
        ],
        out_specs=[
            pl.BlockSpec((TCHUNK, bblock, H), lambda b, c: (c, b, 0)),
            pl.BlockSpec((bblock, H), lambda b, c: (b, 0)),
            pl.BlockSpec((bblock, H), lambda b, c: (b, 0)),
        ],
        scratch_shapes=[pltpu.VMEM((bblock, H), jnp.float32),
                        pltpu.VMEM((bblock, H), jnp.float32),
                        pltpu.VMEM((bblock, H), jnp.float32)],
    )
    out_p, hF, cF = pl.pallas_call(
        _make_decoder_kernel(T, TCHUNK, H),
        out_shape=out_shape,
        grid_spec=grid_spec,
        compiler_params=pltpu.CompilerParams(
            dimension_semantics=("parallel", "arbitrary"),
            vmem_limit_bytes=VMEM_LIMIT),
    )(x_pre, context, h0, c0,
      p["dec_wf"], p["dec_wh"], p["att_w_in"], p["att_w_oc"], p["att_w_oh"])

    out = out_p[:T, :B]
    # Attention weights are not emitted: NMTModel.forward discards _attn.
    return out, (hF[:B], cF[:B]), None


# ----------------------------------------------------------------------------
# NMTModel.forward
# ----------------------------------------------------------------------------
def nmt_forward(params, inputs, is_fert, pre_train, use_uni=False):
    src = inputs[0]                                   # (S, B) int32
    tgt = (inputs[2] if use_uni else inputs[1])[:-1]  # drop last target token
    S, B = src.shape

    # encoder(src, is_fert=not pre_train): fertility head hoisted out of the recurrent
    # kernel into one batched XLA matmul on the context (off the serial path).
    enc_hidden, context = encoder_forward(params, src)          # (B_pad, S, H) bf16
    fert_logits = (jnp.einsum('bsh,hf->sbf',
                              context[:B].astype(jnp.float32), params["w_fert"])
                   + params["b_fert"])                          # (S, B, F)

    if is_fert:
        return fert_logits, None

    if pre_train:
        fert = inputs[3]
    else:
        # torch.max(fert, dim=-1)[1].float() -- plain XLA argmax (off critical path).
        fert = jnp.argmax(fert_logits, axis=-1).astype(jnp.float32)   # (S, B)

    # init_output = zeros(B, hidden) is initialized inside the decoder kernel.
    out, dec_hidden, _attn = decoder_forward(params, tgt, enc_hidden, context)
    return out, fert


# ----------------------------------------------------------------------------
# Deterministic parameter construction + example run
# ----------------------------------------------------------------------------
def make_params(key, src_vocab, tgt_vocab, emb_dim, hidden, n_fert):
    def u(k, shape):
        return jax.random.uniform(k, shape, jnp.float32, -0.1, 0.1)

    ks = jax.random.split(key, 14)
    E, H = emb_dim, hidden
    return {
        "emb_dim": E, "hidden": H, "n_fert": n_fert,
        # encoder LSTM: split weights (x projection hoisted; W_h on recurrent path)
        "enc_emb": u(ks[0], (src_vocab, E)),
        "enc_wx":  u(ks[1], (E, 4 * H)).astype(jnp.bfloat16),
        "enc_wh":  u(ks[2], (H, 4 * H)).astype(jnp.bfloat16),
        "enc_b":   u(ks[3], (1, 4 * H)),
        # fertility head (hoisted; plain XLA matmul on context)
        "w_fert":  u(ks[4], (H, n_fert)),
        "b_fert":  u(ks[5], (1, n_fert)),
        # decoder input-feed LSTM: split weights over emb / feed / h
        "dec_emb": u(ks[6], (tgt_vocab, E)),
        "dec_wx":  u(ks[7], (E, 4 * H)).astype(jnp.bfloat16),
        "dec_wf":  u(ks[8], (H, 4 * H)).astype(jnp.bfloat16),
        "dec_wh":  u(ks[9], (H, 4 * H)).astype(jnp.bfloat16),
        "dec_b":   u(ks[10], (1, 4 * H)),
        # global attention ("general"): W_in (per-step query projection),
        # linear_out split into the wctx / h halves (no concat in the kernel)
        "att_w_in": u(ks[11], (H, H)).astype(jnp.bfloat16),
        "att_w_oc": u(ks[12], (H, H)).astype(jnp.bfloat16),
        "att_w_oh": u(ks[13], (H, H)).astype(jnp.bfloat16),
    }


if __name__ == "__main__":
    key = jax.random.PRNGKey(0)
    S, T_full, B = 8, 9, 2
    EMB, HID, NF = 32, 32, 8
    SRC_V, TGT_V = 50, 60

    kp, k1, k2, k3, k4 = jax.random.split(key, 5)
    params = make_params(kp, SRC_V, TGT_V, EMB, HID, NF)

    src = jax.random.randint(k1, (S, B), 0, SRC_V, dtype=jnp.int32)
    tgt = jax.random.randint(k2, (T_full, B), 0, TGT_V, dtype=jnp.int32)
    tgt_uni = jax.random.randint(k3, (T_full, B), 0, TGT_V, dtype=jnp.int32)
    fert_gt = jax.random.randint(k4, (S, B), 0, NF, dtype=jnp.int32).astype(jnp.float32)
    inputs = (src, tgt, tgt_uni, fert_gt)

    # Main path: is_fert=False, pre_train=False (argmax-fertility + full decoder).
    out, fert = nmt_forward(params, inputs, is_fert=False, pre_train=False)
    out = jax.block_until_ready(out)
    fert = jax.block_until_ready(fert)
    assert out.shape == (T_full - 1, B, HID), out.shape
    assert fert.shape == (S, B), fert.shape

    # Fertility-pretraining path: is_fert=True returns raw fertility logits.
    fert_logits, none_out = nmt_forward(params, inputs, is_fert=True, pre_train=False)
    fert_logits = jax.block_until_ready(fert_logits)
    assert fert_logits.shape == (S, B, NF) and none_out is None

    # pre_train path: fertility taken from inputs[3].
    out2, fert2 = nmt_forward(params, inputs, is_fert=False, pre_train=True)
    out2 = jax.block_until_ready(out2)
    assert out2.shape == (T_full - 1, B, HID) and fert2.shape == (S, B)

    print("KERNEL_OK")
</pallas_src>

<mosaic_0001>
module attributes {stable_mosaic.version = 11 : i64} {
  func.func @kernel(%arg0: i32, %arg1: i32, %arg2: memref<8x8x128xf32, #tpu.memory_space<vmem>>, %arg3: memref<32x128xbf16, #tpu.memory_space<vmem>>, %arg4: memref<8x8x32xbf16, #tpu.memory_space<vmem>>, %arg5: memref<8x32xf32, #tpu.memory_space<vmem>>, %arg6: memref<8x32xf32, #tpu.memory_space<vmem>>, %arg7: memref<8x32xf32, #tpu.memory_space<vmem>>, %arg8: memref<8x32xf32, #tpu.memory_space<vmem>>) attributes {dimension_semantics = [#tpu.dimension_semantics<parallel>, #tpu.dimension_semantics<arbitrary>], iteration_bounds = array<i64: 1, 1>, scalar_prefetch = 0 : i64, scratch_operands = 2 : i64, tpu.core_type = #tpu.core_type<tc>, window_params = [{transform_indices = @transform_0, window_bounds = array<i64: 8, 8, 128>}, {pipeline_mode = #tpu.pipeline_mode<synchronous>, transform_indices = @transform_1, window_bounds = array<i64: 32, 128>}, {transform_indices = @transform_2, window_bounds = array<i64: 8, 8, 32>}, {transform_indices = @transform_3, window_bounds = array<i64: 8, 32>}, {transform_indices = @transform_4, window_bounds = array<i64: 8, 32>}]} {
    %c0_i32 = arith.constant 0 : i32
    %0 = arith.cmpi eq, %arg1, %c0_i32 : i32
    %1 = arith.extui %0 : i1 to i32
    %c0_i32_0 = arith.constant 0 : i32
    %2 = arith.cmpi ne, %1, %c0_i32_0 : i32
    scf.if %2 {
      %cst_140 = arith.constant 0.000000e+00 : f32
      %311 = vector.broadcast %cst_140 : f32 to vector<8x32xf32>
      %c0_141 = arith.constant 0 : index
      %c0_142 = arith.constant 0 : index
      %312 = vector.load %arg7[%c0_141, %c0_142] : memref<8x32xf32, #tpu.memory_space<vmem>>, vector<8x32xf32>
      tpu.vector_store %arg7[%c0_141, %c0_142], %311 {strides = array<i32>} : memref<8x32xf32, #tpu.memory_space<vmem>>, vector<8x32xf32>,
      %cst_143 = arith.constant 0.000000e+00 : f32
      %313 = vector.broadcast %cst_143 : f32 to vector<8x32xf32>
      %c0_144 = arith.constant 0 : index
      %c0_145 = arith.constant 0 : index
      %314 = vector.load %arg8[%c0_144, %c0_145] : memref<8x32xf32, #tpu.memory_space<vmem>>, vector<8x32xf32>
      tpu.vector_store %arg8[%c0_144, %c0_145], %313 {strides = array<i32>} : memref<8x32xf32, #tpu.memory_space<vmem>>, vector<8x32xf32>,
    } else {
    }
    %c0 = arith.constant 0 : index
    %c0_1 = arith.constant 0 : index
    %3 = vector.load %arg3[%c0, %c0_1] : memref<32x128xbf16, #tpu.memory_space<vmem>>, vector<32x128xbf16>
    %c0_2 = arith.constant 0 : index
    %c0_3 = arith.constant 0 : index
    %4 = vector.load %arg7[%c0_2, %c0_3] : memref<8x32xf32, #tpu.memory_space<vmem>>, vector<8x32xf32>
    %c0_4 = arith.constant 0 : index
    %c0_5 = arith.constant 0 : index
    %5 = vector.load %arg8[%c0_4, %c0_5] : memref<8x32xf32, #tpu.memory_space<vmem>>, vector<8x32xf32>
    %c0_6 = arith.constant 0 : index
    %c0_7 = arith.constant 0 : index
    %c0_8 = arith.constant 0 : index
    %6 = vector.load %arg2[%c0_6, %c0_7, %c0_8] : memref<8x8x128xf32, #tpu.memory_space<vmem>>, vector<1x8x128xf32>
    %7 = vector.shape_cast %6 : vector<1x8x128xf32> to vector<8x128xf32>
    %8 = arith.truncf %4 : vector<8x32xf32> to vector<8x32xbf16>
    %cst = arith.constant dense<0.000000e+00> : vector<8x128xf32>
    %9 = tpu.matmul %8, %3, %cst {dimension_numbers = #tpu.dot_dimension_numbers<[1], [0], [0], [1], [0, 0, 1, 1], [], []>} : vector<8x32xbf16>, vector<32x128xbf16>, vector<8x128xf32> -> vector<8x128xf32>
    %10 = arith.addf %7, %9 : vector<8x128xf32>
    %11 = vector.extract_strided_slice %10 {offsets = [0, 0], sizes = [8, 32], strides = [1, 1]} : vector<8x128xf32> to vector<8x32xf32>
    %12 = arith.negf %11 : vector<8x32xf32>
    %13 = math.exp %12 : vector<8x32xf32>
    %cst_9 = arith.constant 1.000000e+00 : f32
    %14 = vector.broadcast %cst_9 : f32 to vector<8x32xf32>
    %15 = arith.addf %14, %13 : vector<8x32xf32>
    %16 = arith.divf %14, %15 : vector<8x32xf32>
    %17 = vector.extract_strided_slice %10 {offsets = [0, 32], sizes = [8, 32], strides = [1, 1]} : vector<8x128xf32> to vector<8x32xf32>
    %18 = arith.negf %17 : vector<8x32xf32>
    %19 = math.exp %18 : vector<8x32xf32>
    %cst_10 = arith.constant 1.000000e+00 : f32
    %20 = vector.broadcast %cst_10 : f32 to vector<8x32xf32>
    %21 = arith.addf %20, %19 : vector<8x32xf32>
    %22 = arith.divf %20, %21 : vector<8x32xf32>
    %23 = vector.extract_strided_slice %10 {offsets = [0, 64], sizes = [8, 32], strides = [1, 1]} : vector<8x128xf32> to vector<8x32xf32>
    %24 = math.tanh %23 : vector<8x32xf32>
    %25 = vector.extract_strided_slice %10 {offsets = [0, 96], sizes = [8, 32], strides = [1, 1]} : vector<8x128xf32> to vector<8x32xf32>
    %26 = arith.negf %25 : vector<8x32xf32>
    %27 = math.exp %26 : vector<8x32xf32>
    %cst_11 = arith.constant 1.000000e+00 : f32
    %28 = vector.broadcast %cst_11 : f32 to vector<8x32xf32>
    %29 = arith.addf %28, %27 : vector<8x32xf32>
    %30 = arith.divf %28, %29 : vector<8x32xf32>
    %31 = arith.mulf %22, %5 : vector<8x32xf32>
    %32 = arith.mulf %16, %24 : vector<8x32xf32>
    %33 = arith.addf %31, %32 : vector<8x32xf32>
    %34 = math.tanh %33 : vector<8x32xf32>
    %35 = arith.mulf %30, %34 : vector<8x32xf32>
    %c0_12 = arith.constant 0 : index
    %c0_13 = arith.constant 0 : index
    %36 = vector.load %arg7[%c0_12, %c0_13] : memref<8x32xf32, #tpu.memory_space<vmem>>, vector<8x32xf32>
    tpu.vector_store %arg7[%c0_12, %c0_13], %35 {strides = array<i32>} : memref<8x32xf32, #tpu.memory_space<vmem>>, vector<8x32xf32>,
    %c0_14 = arith.constant 0 : index
    %c0_15 = arith.constant 0 : index
    %37 = vector.load %arg8[%c0_14, %c0_15] : memref<8x32xf32, #tpu.memory_space<vmem>>, vector<8x32xf32>
    tpu.vector_store %arg8[%c0_14, %c0_15], %33 {strides = array<i32>} : memref<8x32xf32, #tpu.memory_space<vmem>>, vector<8x32xf32>,
    %38 = arith.truncf %35 : vector<8x32xf32> to vector<8x32xbf16>
    %c0_16 = arith.constant 0 : index
    %c0_17 = arith.constant 0 : index
    %c0_18 = arith.constant 0 : index
    %39 = vector.load %arg4[%c0_16, %c0_17, %c0_18] : memref<8x8x32xbf16, #tpu.memory_space<vmem>>, vector<1x8x32xbf16>
    %40 = vector.shape_cast %39 : vector<1x8x32xbf16> to vector<8x32xbf16>
    %41 = vector.shape_cast %38 : vector<8x32xbf16> to vector<1x8x32xbf16>
    tpu.vector_store %arg4[%c0_16, %c0_17, %c0_18], %41 {strides = array<i32>} : memref<8x8x32xbf16, #tpu.memory_space<vmem>>, vector<1x8x32xbf16>,
    %c0_19 = arith.constant 0 : index
    %c0_20 = arith.constant 0 : index
    %42 = vector.load %arg7[%c0_19, %c0_20] : memref<8x32xf32, #tpu.memory_space<vmem>>, vector<8x32xf32>
    %c0_21 = arith.constant 0 : index
    %c0_22 = arith.constant 0 : index
    %43 = vector.load %arg8[%c0_21, %c0_22] : memref<8x32xf32, #tpu.memory_space<vmem>>, vector<8x32xf32>
    %c1 = arith.constant 1 : index
    %c0_23 = arith.constant 0 : index
    %c0_24 = arith.constant 0 : index
    %44 = vector.load %arg2[%c1, %c0_23, %c0_24] : memref<8x8x128xf32, #tpu.memory_space<vmem>>, vector<1x8x128xf32>
    %45 = vector.shape_cast %44 : vector<1x8x128xf32> to vector<8x128xf32>
    %46 = arith.truncf %42 : vector<8x32xf32> to vector<8x32xbf16>
    %cst_25 = arith.constant dense<0.000000e+00> : vector<8x128xf32>
    %47 = tpu.matmul %46, %3, %cst_25 {dimension_numbers = #tpu.dot_dimension_numbers<[1], [0], [0], [1], [0, 0, 1, 1], [], []>} : vector<8x32xbf16>, vector<32x128xbf16>, vector<8x128xf32> -> vector<8x128xf32>
    %48 = arith.addf %45, %47 : vector<8x128xf32>
    %49 = vector.extract_strided_slice %48 {offsets = [0, 0], sizes = [8, 32], strides = [1, 1]} : vector<8x128xf32> to vector<8x32xf32>
    %50 = arith.negf %49 : vector<8x32xf32>
    %51 = math.exp %50 : vector<8x32xf32>
    %cst_26 = arith.constant 1.000000e+00 : f32
    %52 = vector.broadcast %cst_26 : f32 to vector<8x32xf32>
    %53 = arith.addf %52, %51 : vector<8x32xf32>
    %54 = arith.divf %52, %53 : vector<8x32xf32>
    %55 = vector.extract_strided_slice %48 {offsets = [0, 32], sizes = [8, 32], strides = [1, 1]} : vector<8x128xf32> to vector<8x32xf32>
    %56 = arith.negf %55 : vector<8x32xf32>
    %57 = math.exp %56 : vector<8x32xf32>
    %cst_27 = arith.constant 1.000000e+00 : f32
    %58 = vector.broadcast %cst_27 : f32 to vector<8x32xf32>
    %59 = arith.addf %58, %57 : vector<8x32xf32>
    %60 = arith.divf %58, %59 : vector<8x32xf32>
    %61 = vector.extract_strided_slice %48 {offsets = [0, 64], sizes = [8, 32], strides = [1, 1]} : vector<8x128xf32> to vector<8x32xf32>
    %62 = math.tanh %61 : vector<8x32xf32>
    %63 = vector.extract_strided_slice %48 {offsets = [0, 96], sizes = [8, 32], strides = [1, 1]} : vector<8x128xf32> to vector<8x32xf32>
    %64 = arith.negf %63 : vector<8x32xf32>
    %65 = math.exp %64 : vector<8x32xf32>
    %cst_28 = arith.constant 1.000000e+00 : f32
    %66 = vector.broadcast %cst_28 : f32 to vector<8x32xf32>
    %67 = arith.addf %66, %65 : vector<8x32xf32>
    %68 = arith.divf %66, %67 : vector<8x32xf32>
    %69 = arith.mulf %60, %43 : vector<8x32xf32>
    %70 = arith.mulf %54, %62 : vector<8x32xf32>
    %71 = arith.addf %69, %70 : vector<8x32xf32>
    %72 = math.tanh %71 : vector<8x32xf32>
    %73 = arith.mulf %68, %72 : vector<8x32xf32>
    %c0_29 = arith.constant 0 : index
    %c0_30 = arith.constant 0 : index
    %74 = vector.load %arg7[%c0_29, %c0_30] : memref<8x32xf32, #tpu.memory_space<vmem>>, vector<8x32xf32>
    tpu.vector_store %arg7[%c0_29, %c0_30], %73 {strides = array<i32>} : memref<8x32xf32, #tpu.memory_space<vmem>>, vector<8x32xf32>,
    %c0_31 = arith.constant 0 : index
    %c0_32 = arith.constant 0 : index
    %75 = vector.load %arg8[%c0_31, %c0_32] : memref<8x32xf32, #tpu.memory_space<vmem>>, vector<8x32xf32>
    tpu.vector_store %arg8[%c0_31, %c0_32], %71 {strides = array<i32>} : memref<8x32xf32, #tpu.memory_space<vmem>>, vector<8x32xf32>,
    %76 = arith.truncf %73 : vector<8x32xf32> to vector<8x32xbf16>
    %c1_33 = arith.constant 1 : index
    %c0_34 = arith.constant 0 : index
    %c0_35 = arith.constant 0 : index
    %77 = vector.load %arg4[%c1_33, %c0_34, %c0_35] : memref<8x8x32xbf16, #tpu.memory_space<vmem>>, vector<1x8x32xbf16>
    %78 = vector.shape_cast %77 : vector<1x8x32xbf16> to vector<8x32xbf16>
    %79 = vector.shape_cast %76 : vector<8x32xbf16> to vector<1x8x32xbf16>
    tpu.vector_store %arg4[%c1_33, %c0_34, %c0_35], %79 {strides = array<i32>} : memref<8x8x32xbf16, #tpu.memory_space<vmem>>, vector<1x8x32xbf16>,
    %c0_36 = arith.constant 0 : index
    %c0_37 = arith.constant 0 : index
    %80 = vector.load %arg7[%c0_36, %c0_37] : memref<8x32xf32, #tpu.memory_space<vmem>>, vector<8x32xf32>
    %c0_38 = arith.constant 0 : index
    %c0_39 = arith.constant 0 : index
    %81 = vector.load %arg8[%c0_38, %c0_39] : memref<8x32xf32, #tpu.memory_space<vmem>>, vector<8x32xf32>
    %c2 = arith.constant 2 : index
    %c0_40 = arith.constant 0 : index
    %c0_41 = arith.constant 0 : index
    %82 = vector.load %arg2[%c2, %c0_40, %c0_41] : memref<8x8x128xf32, #tpu.memory_space<vmem>>, vector<1x8x128xf32>
    %83 = vector.shape_cast %82 : vector<1x8x128xf32> to vector<8x128xf32>
    %84 = arith.truncf %80 : vector<8x32xf32> to vector<8x32xbf16>
    %cst_42 = arith.constant dense<0.000000e+00> : vector<8x128xf32>
    %85 = tpu.matmul %84, %3, %cst_42 {dimension_numbers = #tpu.dot_dimension_numbers<[1], [0], [0], [1], [0, 0, 1, 1], [], []>} : vector<8x32xbf16>, vector<32x128xbf16>, vector<8x128xf32> -> vector<8x128xf32>
    %86 = arith.addf %83, %85 : vector<8x128xf32>
    %87 = vector.extract_strided_slice %86 {offsets = [0, 0], sizes = [8, 32], strides = [1, 1]} : vector<8x128xf32> to vector<8x32xf32>
    %88 = arith.negf %87 : vector<8x32xf32>
    %89 = math.exp %88 : vector<8x32xf32>
    %cst_43 = arith.constant 1.000000e+00 : f32
    %90 = vector.broadcast %cst_43 : f32 to vector<8x32xf32>
    %91 = arith.addf %90, %89 : vector<8x32xf32>
    %92 = arith.divf %90, %91 : vector<8x32xf32>
    %93 = vector.extract_strided_slice %86 {offsets = [0, 32], sizes = [8, 32], strides = [1, 1]} : vector<8x128xf32> to vector<8x32xf32>
    %94 = arith.negf %93 : vector<8x32xf32>
    %95 = math.exp %94 : vector<8x32xf32>
    %cst_44 = arith.constant 1.000000e+00 : f32
    %96 = vector.broadcast %cst_44 : f32 to vector<8x32xf32>
    %97 = arith.addf %96, %95 : vector<8x32xf32>
    %98 = arith.divf %96, %97 : vector<8x32xf32>
    %99 = vector.extract_strided_slice %86 {offsets = [0, 64], sizes = [8, 32], strides = [1, 1]} : vector<8x128xf32> to vector<8x32xf32>
    %100 = math.tanh %99 : vector<8x32xf32>
    %101 = vector.extract_strided_slice %86 {offsets = [0, 96], sizes = [8, 32], strides = [1, 1]} : vector<8x128xf32> to vector<8x32xf32>
    %102 = arith.negf %101 : vector<8x32xf32>
    %103 = math.exp %102 : vector<8x32xf32>
    %cst_45 = arith.constant 1.000000e+00 : f32
    %104 = vector.broadcast %cst_45 : f32 to vector<8x32xf32>
    %105 = arith.addf %104, %103 : vector<8x32xf32>
    %106 = arith.divf %104, %105 : vector<8x32xf32>
    %107 = arith.mulf %98, %81 : vector<8x32xf32>
    %108 = arith.mulf %92, %100 : vector<8x32xf32>
    %109 = arith.addf %107, %108 : vector<8x32xf32>
    %110 = math.tanh %109 : vector<8x32xf32>
    %111 = arith.mulf %106, %110 : vector<8x32xf32>
    %c0_46 = arith.constant 0 : index
    %c0_47 = arith.constant 0 : index
    %112 = vector.load %arg7[%c0_46, %c0_47] : memref<8x32xf32, #tpu.memory_space<vmem>>, vector<8x32xf32>
    tpu.vector_store %arg7[%c0_46, %c0_47], %111 {strides = array<i32>} : memref<8x32xf32, #tpu.memory_space<vmem>>, vector<8x32xf32>,
    %c0_48 = arith.constant 0 : index
    %c0_49 = arith.constant 0 : index
    %113 = vector.load %arg8[%c0_48, %c0_49] : memref<8x32xf32, #tpu.memory_space<vmem>>, vector<8x32xf32>
    tpu.vector_store %arg8[%c0_48, %c0_49], %109 {strides = array<i32>} : memref<8x32xf32, #tpu.memory_space<vmem>>, vector<8x32xf32>,
    %114 = arith.truncf %111 : vector<8x32xf32> to vector<8x32xbf16>
    %c2_50 = arith.constant 2 : index
    %c0_51 = arith.constant 0 : index
    %c0_52 = arith.constant 0 : index
    %115 = vector.load %arg4[%c2_50, %c0_51, %c0_52] : memref<8x8x32xbf16, #tpu.memory_space<vmem>>, vector<1x8x32xbf16>
    %116 = vector.shape_cast %115 : vector<1x8x32xbf16> to vector<8x32xbf16>
    %117 = vector.shape_cast %114 : vector<8x32xbf16> to vector<1x8x32xbf16>
    tpu.vector_store %arg4[%c2_50, %c0_51, %c0_52], %117 {strides = array<i32>} : memref<8x8x32xbf16, #tpu.memory_space<vmem>>, vector<1x8x32xbf16>,
    %c0_53 = arith.constant 0 : index
    %c0_54 = arith.constant 0 : index
    %118 = vector.load %arg7[%c0_53, %c0_54] : memref<8x32xf32, #tpu.memory_space<vmem>>, vector<8x32xf32>
    %c0_55 = arith.constant 0 : index
    %c0_56 = arith.constant 0 : index
    %119 = vector.load %arg8[%c0_55, %c0_56] : memref<8x32xf32, #tpu.memory_space<vmem>>, vector<8x32xf32>
    %c3 = arith.constant 3 : index
    %c0_57 = arith.constant 0 : index
    %c0_58 = arith.constant 0 : index
    %120 = vector.load %arg2[%c3, %c0_57, %c0_58] : memref<8x8x128xf32, #tpu.memory_space<vmem>>, vector<1x8x128xf32>
    %121 = vector.shape_cast %120 : vector<1x8x128xf32> to vector<8x128xf32>
    %122 = arith.truncf %118 : vector<8x32xf32> to vector<8x32xbf16>
    %cst_59 = arith.constant dense<0.000000e+00> : vector<8x128xf32>
    %123 = tpu.matmul %122, %3, %cst_59 {dimension_numbers = #tpu.dot_dimension_numbers<[1], [0], [0], [1], [0, 0, 1, 1], [], []>} : vector<8x32xbf16>, vector<32x128xbf16>, vector<8x128xf32> -> vector<8x128xf32>
    %124 = arith.addf %121, %123 : vector<8x128xf32>
    %125 = vector.extract_strided_slice %124 {offsets = [0, 0], sizes = [8, 32], strides = [1, 1]} : vector<8x128xf32> to vector<8x32xf32>
    %126 = arith.negf %125 : vector<8x32xf32>
    %127 = math.exp %126 : vector<8x32xf32>
    %cst_60 = arith.constant 1.000000e+00 : f32
    %128 = vector.broadcast %cst_60 : f32 to vector<8x32xf32>
    %129 = arith.addf %128, %127 : vector<8x32xf32>
    %130 = arith.divf %128, %129 : vector<8x32xf32>
    %131 = vector.extract_strided_slice %124 {offsets = [0, 32], sizes = [8, 32], strides = [1, 1]} : vector<8x128xf32> to vector<8x32xf32>
    %132 = arith.negf %131 : vector<8x32xf32>
    %133 = math.exp %132 : vector<8x32xf32>
    %cst_61 = arith.constant 1.000000e+00 : f32
    %134 = vector.broadcast %cst_61 : f32 to vector<8x32xf32>
    %135 = arith.addf %134, %133 : vector<8x32xf32>
    %136 = arith.divf %134, %135 : vector<8x32xf32>
    %137 = vector.extract_strided_slice %124 {offsets = [0, 64], sizes = [8, 32], strides = [1, 1]} : vector<8x128xf32> to vector<8x32xf32>
    %138 = math.tanh %137 : vector<8x32xf32>
    %139 = vector.extract_strided_slice %124 {offsets = [0, 96], sizes = [8, 32], strides = [1, 1]} : vector<8x128xf32> to vector<8x32xf32>
    %140 = arith.negf %139 : vector<8x32xf32>
    %141 = math.exp %140 : vector<8x32xf32>
    %cst_62 = arith.constant 1.000000e+00 : f32
    %142 = vector.broadcast %cst_62 : f32 to vector<8x32xf32>
    %143 = arith.addf %142, %141 : vector<8x32xf32>
    %144 = arith.divf %142, %143 : vector<8x32xf32>
    %145 = arith.mulf %136, %119 : vector<8x32xf32>
    %146 = arith.mulf %130, %138 : vector<8x32xf32>
    %147 = arith.addf %145, %146 : vector<8x32xf32>
    %148 = math.tanh %147 : vector<8x32xf32>
    %149 = arith.mulf %144, %148 : vector<8x32xf32>
    %c0_63 = arith.constant 0 : index
    %c0_64 = arith.constant 0 : index
    %150 = vector.load %arg7[%c0_63, %c0_64] : memref<8x32xf32, #tpu.memory_space<vmem>>, vector<8x32xf32>
    tpu.vector_store %arg7[%c0_63, %c0_64], %149 {strides = array<i32>} : memref<8x32xf32, #tpu.memory_space<vmem>>, vector<8x32xf32>,
    %c0_65 = arith.constant 0 : index
    %c0_66 = arith.constant 0 : index
    %151 = vector.load %arg8[%c0_65, %c0_66] : memref<8x32xf32, #tpu.memory_space<vmem>>, vector<8x32xf32>
    tpu.vector_store %arg8[%c0_65, %c0_66], %147 {strides = array<i32>} : memref<8x32xf32, #tpu.memory_space<vmem>>, vector<8x32xf32>,
    %152 = arith.truncf %149 : vector<8x32xf32> to vector<8x32xbf16>
    %c3_67 = arith.constant 3 : index
    %c0_68 = arith.constant 0 : index
    %c0_69 = arith.constant 0 : index
    %153 = vector.load %arg4[%c3_67, %c0_68, %c0_69] : memref<8x8x32xbf16, #tpu.memory_space<vmem>>, vector<1x8x32xbf16>
    %154 = vector.shape_cast %153 : vector<1x8x32xbf16> to vector<8x32xbf16>
    %155 = vector.shape_cast %152 : vector<8x32xbf16> to vector<1x8x32xbf16>
    tpu.vector_store %arg4[%c3_67, %c0_68, %c0_69], %155 {strides = array<i32>} : memref<8x8x32xbf16, #tpu.memory_space<vmem>>, vector<1x8x32xbf16>,
    %c0_70 = arith.constant 0 : index
    %c0_71 = arith.constant 0 : index
    %156 = vector.load %arg7[%c0_70, %c0_71] : memref<8x32xf32, #tpu.memory_space<vmem>>, vector<8x32xf32>
    %c0_72 = arith.constant 0 : index
    %c0_73 = arith.constant 0 : index
    %157 = vector.load %arg8[%c0_72, %c0_73] : memref<8x32xf32, #tpu.memory_space<vmem>>, vector<8x32xf32>
    %c4 = arith.constant 4 : index
    %c0_74 = arith.constant 0 : index
    %c0_75 = arith.constant 0 : index
    %158 = vector.load %arg2[%c4, %c0_74, %c0_75] : memref<8x8x128xf32, #tpu.memory_space<vmem>>, vector<1x8x128xf32>
    %159 = vector.shape_cast %158 : vector<1x8x128xf32> to vector<8x128xf32>
    %160 = arith.truncf %156 : vector<8x32xf32> to vector<8x32xbf16>
    %cst_76 = arith.constant dense<0.000000e+00> : vector<8x128xf32>
    %161 = tpu.matmul %160, %3, %cst_76 {dimension_numbers = #tpu.dot_dimension_numbers<[1], [0], [0], [1], [0, 0, 1, 1], [], []>} : vector<8x32xbf16>, vector<32x128xbf16>, vector<8x128xf32> -> vector<8x128xf32>
    %162 = arith.addf %159, %161 : vector<8x128xf32>
    %163 = vector.extract_strided_slice %162 {offsets = [0, 0], sizes = [8, 32], strides = [1, 1]} : vector<8x128xf32> to vector<8x32xf32>
    %164 = arith.negf %163 : vector<8x32xf32>
    %165 = math.exp %164 : vector<8x32xf32>
    %cst_77 = arith.constant 1.000000e+00 : f32
    %166 = vector.broadcast %cst_77 : f32 to vector<8x32xf32>
    %167 = arith.addf %166, %165 : vector<8x32xf32>
    %168 = arith.divf %166, %167 : vector<8x32xf32>
    %169 = vector.extract_strided_slice %162 {offsets = [0, 32], sizes = [8, 32], strides = [1, 1]} : vector<8x128xf32> to vector<8x32xf32>
    %170 = arith.negf %169 : vector<8x32xf32>
    %171 = math.exp %170 : vector<8x32xf32>
    %cst_78 = arith.constant 1.000000e+00 : f32
    %172 = vector.broadcast %cst_78 : f32 to vector<8x32xf32>
    %173 = arith.addf %172, %171 : vector<8x32xf32>
    %174 = arith.divf %172, %173 : vector<8x32xf32>
    %175 = vector.extract_strided_slice %162 {offsets = [0, 64], sizes = [8, 32], strides = [1, 1]} : vector<8x128xf32> to vector<8x32xf32>
    %176 = math.tanh %175 : vector<8x32xf32>
    %177 = vector.extract_strided_slice %162 {offsets = [0, 96], sizes = [8, 32], strides = [1, 1]} : vector<8x128xf32> to vector<8x32xf32>
    %178 = arith.negf %177 : vector<8x32xf32>
    %179 = math.exp %178 : vector<8x32xf32>
    %cst_79 = arith.constant 1.000000e+00 : f32
    %180 = vector.broadcast %cst_79 : f32 to vector<8x32xf32>
    %181 = arith.addf %180, %179 : vector<8x32xf32>
    %182 = arith.divf %180, %181 : vector<8x32xf32>
    %183 = arith.mulf %174, %157 : vector<8x32xf32>
    %184 = arith.mulf %168, %176 : vector<8x32xf32>
    %185 = arith.addf %183, %184 : vector<8x32xf32>
    %186 = math.tanh %185 : vector<8x32xf32>
    %187 = arith.mulf %182, %186 : vector<8x32xf32>
    %c0_80 = arith.constant 0 : index
    %c0_81 = arith.constant 0 : index
    %188 = vector.load %arg7[%c0_80, %c0_81] : memref<8x32xf32, #tpu.memory_space<vmem>>, vector<8x32xf32>
    tpu.vector_store %arg7[%c0_80, %c0_81], %187 {strides = array<i32>} : memref<8x32xf32, #tpu.memory_space<vmem>>, vector<8x32xf32>,
    %c0_82 = arith.constant 0 : index
    %c0_83 = arith.constant 0 : index
    %189 = vector.load %arg8[%c0_82, %c0_83] : memref<8x32xf32, #tpu.memory_space<vmem>>, vector<8x32xf32>
    tpu.vector_store %arg8[%c0_82, %c0_83], %185 {strides = array<i32>} : memref<8x32xf32, #tpu.memory_space<vmem>>, vector<8x32xf32>,
    %190 = arith.truncf %187 : vector<8x32xf32> to vector<8x32xbf16>
    %c4_84 = arith.constant 4 : index
    %c0_85 = arith.constant 0 : index
    %c0_86 = arith.constant 0 : index
    %191 = vector.load %arg4[%c4_84, %c0_85, %c0_86] : memref<8x8x32xbf16, #tpu.memory_space<vmem>>, vector<1x8x32xbf16>
    %192 = vector.shape_cast %191 : vector<1x8x32xbf16> to vector<8x32xbf16>
    %193 = vector.shape_cast %190 : vector<8x32xbf16> to vector<1x8x32xbf16>
    tpu.vector_store %arg4[%c4_84, %c0_85, %c0_86], %193 {strides = array<i32>} : memref<8x8x32xbf16, #tpu.memory_space<vmem>>, vector<1x8x32xbf16>,
    %c0_87 = arith.constant 0 : index
    %c0_88 = arith.constant 0 : index
    %194 = vector.load %arg7[%c0_87, %c0_88] : memref<8x32xf32, #tpu.memory_space<vmem>>, vector<8x32xf32>
    %c0_89 = arith.constant 0 : index
    %c0_90 = arith.constant 0 : index
    %195 = vector.load %arg8[%c0_89, %c0_90] : memref<8x32xf32, #tpu.memory_space<vmem>>, vector<8x32xf32>
    %c5 = arith.constant 5 : index
    %c0_91 = arith.constant 0 : index
    %c0_92 = arith.constant 0 : index
    %196 = vector.load %arg2[%c5, %c0_91, %c0_92] : memref<8x8x128xf32, #tpu.memory_space<vmem>>, vector<1x8x128xf32>
    %197 = vector.shape_cast %196 : vector<1x8x128xf32> to vector<8x128xf32>
    %198 = arith.truncf %194 : vector<8x32xf32> to vector<8x32xbf16>
    %cst_93 = arith.constant dense<0.000000e+00> : vector<8x128xf32>
    %199 = tpu.matmul %198, %3, %cst_93 {dimension_numbers = #tpu.dot_dimension_numbers<[1], [0], [0], [1], [0, 0, 1, 1], [], []>} : vector<8x32xbf16>, vector<32x128xbf16>, vector<8x128xf32> -> vector<8x128xf32>
    %200 = arith.addf %197, %199 : vector<8x128xf32>
    %201 = vector.extract_strided_slice %200 {offsets = [0, 0], sizes = [8, 32], strides = [1, 1]} : vector<8x128xf32> to vector<8x32xf32>
    %202 = arith.negf %201 : vector<8x32xf32>
    %203 = math.exp %202 : vector<8x32xf32>
    %cst_94 = arith.constant 1.000000e+00 : f32
    %204 = vector.broadcast %cst_94 : f32 to vector<8x32xf32>
    %205 = arith.addf %204, %203 : vector<8x32xf32>
    %206 = arith.divf %204, %205 : vector<8x32xf32>
    %207 = vector.extract_strided_slice %200 {offsets = [0, 32], sizes = [8, 32], strides = [1, 1]} : vector<8x128xf32> to vector<8x32xf32>
    %208 = arith.negf %207 : vector<8x32xf32>
    %209 = math.exp %208 : vector<8x32xf32>
    %cst_95 = arith.constant 1.000000e+00 : f32
    %210 = vector.broadcast %cst_95 : f32 to vector<8x32xf32>
    %211 = arith.addf %210, %209 : vector<8x32xf32>
    %212 = arith.divf %210, %211 : vector<8x32xf32>
    %213 = vector.extract_strided_slice %200 {offsets = [0, 64], sizes = [8, 32], strides = [1, 1]} : vector<8x128xf32> to vector<8x32xf32>
    %214 = math.tanh %213 : vector<8x32xf32>
    %215 = vector.extract_strided_slice %200 {offsets = [0, 96], sizes = [8, 32], strides = [1, 1]} : vector<8x128xf32> to vector<8x32xf32>
    %216 = arith.negf %215 : vector<8x32xf32>
    %217 = math.exp %216 : vector<8x32xf32>
    %cst_96 = arith.constant 1.000000e+00 : f32
    %218 = vector.broadcast %cst_96 : f32 to vector<8x32xf32>
    %219 = arith.addf %218, %217 : vector<8x32xf32>
    %220 = arith.divf %218, %219 : vector<8x32xf32>
    %221 = arith.mulf %212, %195 : vector<8x32xf32>
    %222 = arith.mulf %206, %214 : vector<8x32xf32>
    %223 = arith.addf %221, %222 : vector<8x32xf32>
    %224 = math.tanh %223 : vector<8x32xf32>
    %225 = arith.mulf %220, %224 : vector<8x32xf32>
    %c0_97 = arith.constant 0 : index
    %c0_98 = arith.constant 0 : index
    %226 = vector.load %arg7[%c0_97, %c0_98] : memref<8x32xf32, #tpu.memory_space<vmem>>, vector<8x32xf32>
    tpu.vector_store %arg7[%c0_97, %c0_98], %225 {strides = array<i32>} : memref<8x32xf32, #tpu.memory_space<vmem>>, vector<8x32xf32>,
    %c0_99 = arith.constant 0 : index
    %c0_100 = arith.constant 0 : index
    %227 = vector.load %arg8[%c0_99, %c0_100] : memref<8x32xf32, #tpu.memory_space<vmem>>, vector<8x32xf32>
    tpu.vector_store %arg8[%c0_99, %c0_100], %223 {strides = array<i32>} : memref<8x32xf32, #tpu.memory_space<vmem>>, vector<8x32xf32>,
    %228 = arith.truncf %225 : vector<8x32xf32> to vector<8x32xbf16>
    %c5_101 = arith.constant 5 : index
    %c0_102 = arith.constant 0 : index
    %c0_103 = arith.constant 0 : index
    %229 = vector.load %arg4[%c5_101, %c0_102, %c0_103] : memref<8x8x32xbf16, #tpu.memory_space<vmem>>, vector<1x8x32xbf16>
    %230 = vector.shape_cast %229 : vector<1x8x32xbf16> to vector<8x32xbf16>
    %231 = vector.shape_cast %228 : vector<8x32xbf16> to vector<1x8x32xbf16>
    tpu.vector_store %arg4[%c5_101, %c0_102, %c0_103], %231 {strides = array<i32>} : memref<8x8x32xbf16, #tpu.memory_space<vmem>>, vector<1x8x32xbf16>,
    %c0_104 = arith.constant 0 : index
    %c0_105 = arith.constant 0 : index
    %232 = vector.load %arg7[%c0_104, %c0_105] : memref<8x32xf32, #tpu.memory_space<vmem>>, vector<8x32xf32>
    %c0_106 = arith.constant 0 : index
    %c0_107 = arith.constant 0 : index
    %233 = vector.load %arg8[%c0_106, %c0_107] : memref<8x32xf32, #tpu.memory_space<vmem>>, vector<8x32xf32>
    %c6 = arith.constant 6 : index
    %c0_108 = arith.constant 0 : index
    %c0_109 = arith.constant 0 : index
    %234 = vector.load %arg2[%c6, %c0_108, %c0_109] : memref<8x8x128xf32, #tpu.memory_space<vmem>>, vector<1x8x128xf32>
    %235 = vector.shape_cast %234 : vector<1x8x128xf32> to vector<8x128xf32>
    %236 = arith.truncf %232 : vector<8x32xf32> to vector<8x32xbf16>
    %cst_110 = arith.constant dense<0.000000e+00> : vector<8x128xf32>
    %237 = tpu.matmul %236, %3, %cst_110 {dimension_numbers = #tpu.dot_dimension_numbers<[1], [0], [0], [1], [0, 0, 1, 1], [], []>} : vector<8x32xbf16>, vector<32x128xbf16>, vector<8x128xf32> -> vector<8x128xf32>
    %238 = arith.addf %235, %237 : vector<8x128xf32>
    %239 = vector.extract_strided_slice %238 {offsets = [0, 0], sizes = [8, 32], strides = [1, 1]} : vector<8x128xf32> to vector<8x32xf32>
    %240 = arith.negf %239 : vector<8x32xf32>
    %241 = math.exp %240 : vector<8x32xf32>
    %cst_111 = arith.constant 1.000000e+00 : f32
    %242 = vector.broadcast %cst_111 : f32 to vector<8x32xf32>
    %243 = arith.addf %242, %241 : vector<8x32xf32>
    %244 = arith.divf %242, %243 : vector<8x32xf32>
    %245 = vector.extract_strided_slice %238 {offsets = [0, 32], sizes = [8, 32], strides = [1, 1]} : vector<8x128xf32> to vector<8x32xf32>
    %246 = arith.negf %245 : vector<8x32xf32>
    %247 = math.exp %246 : vector<8x32xf32>
    %cst_112 = arith.constant 1.000000e+00 : f32
    %248 = vector.broadcast %cst_112 : f32 to vector<8x32xf32>
    %249 = arith.addf %248, %247 : vector<8x32xf32>
    %250 = arith.divf %248, %249 : vector<8x32xf32>
    %251 = vector.extract_strided_slice %238 {offsets = [0, 64], sizes = [8, 32], strides = [1, 1]} : vector<8x128xf32> to vector<8x32xf32>
    %252 = math.tanh %251 : vector<8x32xf32>
    %253 = vector.extract_strided_slice %238 {offsets = [0, 96], sizes = [8, 32], strides = [1, 1]} : vector<8x128xf32> to vector<8x32xf32>
    %254 = arith.negf %253 : vector<8x32xf32>
    %255 = math.exp %254 : vector<8x32xf32>
    %cst_113 = arith.constant 1.000000e+00 : f32
    %256 = vector.broadcast %cst_113 : f32 to vector<8x32xf32>
    %257 = arith.addf %256, %255 : vector<8x32xf32>
    %258 = arith.divf %256, %257 : vector<8x32xf32>
    %259 = arith.mulf %250, %233 : vector<8x32xf32>
    %260 = arith.mulf %244, %252 : vector<8x32xf32>
    %261 = arith.addf %259, %260 : vector<8x32xf32>
    %262 = math.tanh %261 : vector<8x32xf32>
    %263 = arith.mulf %258, %262 : vector<8x32xf32>
    %c0_114 = arith.constant 0 : index
    %c0_115 = arith.constant 0 : index
    %264 = vector.load %arg7[%c0_114, %c0_115] : memref<8x32xf32, #tpu.memory_space<vmem>>, vector<8x32xf32>
    tpu.vector_store %arg7[%c0_114, %c0_115], %263 {strides = array<i32>} : memref<8x32xf32, #tpu.memory_space<vmem>>, vector<8x32xf32>,
    %c0_116 = arith.constant 0 : index
    %c0_117 = arith.constant 0 : index
    %265 = vector.load %arg8[%c0_116, %c0_117] : memref<8x32xf32, #tpu.memory_space<vmem>>, vector<8x32xf32>
    tpu.vector_store %arg8[%c0_116, %c0_117], %261 {strides = array<i32>} : memref<8x32xf32, #tpu.memory_space<vmem>>, vector<8x32xf32>,
    %266 = arith.truncf %263 : vector<8x32xf32> to vector<8x32xbf16>
    %c6_118 = arith.constant 6 : index
    %c0_119 = arith.constant 0 : index
    %c0_120 = arith.constant 0 : index
    %267 = vector.load %arg4[%c6_118, %c0_119, %c0_120] : memref<8x8x32xbf16, #tpu.memory_space<vmem>>, vector<1x8x32xbf16>
    %268 = vector.shape_cast %267 : vector<1x8x32xbf16> to vector<8x32xbf16>
    %269 = vector.shape_cast %266 : vector<8x32xbf16> to vector<1x8x32xbf16>
    tpu.vector_store %arg4[%c6_118, %c0_119, %c0_120], %269 {strides = array<i32>} : memref<8x8x32xbf16, #tpu.memory_space<vmem>>, vector<1x8x32xbf16>,
    %c0_121 = arith.constant 0 : index
    %c0_122 = arith.constant 0 : index
    %270 = vector.load %arg7[%c0_121, %c0_122] : memref<8x32xf32, #tpu.memory_space<vmem>>, vector<8x32xf32>
    %c0_123 = arith.constant 0 : index
    %c0_124 = arith.constant 0 : index
    %271 = vector.load %arg8[%c0_123, %c0_124] : memref<8x32xf32, #tpu.memory_space<vmem>>, vector<8x32xf32>
    %c7 = arith.constant 7 : index
    %c0_125 = arith.constant 0 : index
    %c0_126 = arith.constant 0 : index
    %272 = vector.load %arg2[%c7, %c0_125, %c0_126] : memref<8x8x128xf32, #tpu.memory_space<vmem>>, vector<1x8x128xf32>
    %273 = vector.shape_cast %272 : vector<1x8x128xf32> to vector<8x128xf32>
    %274 = arith.truncf %270 : vector<8x32xf32> to vector<8x32xbf16>
    %cst_127 = arith.constant dense<0.000000e+00> : vector<8x128xf32>
    %275 = tpu.matmul %274, %3, %cst_127 {dimension_numbers = #tpu.dot_dimension_numbers<[1], [0], [0], [1], [0, 0, 1, 1], [], []>} : vector<8x32xbf16>, vector<32x128xbf16>, vector<8x128xf32> -> vector<8x128xf32>
    %276 = arith.addf %273, %275 : vector<8x128xf32>
    %277 = vector.extract_strided_slice %276 {offsets = [0, 0], sizes = [8, 32], strides = [1, 1]} : vector<8x128xf32> to vector<8x32xf32>
    %278 = arith.negf %277 : vector<8x32xf32>
    %279 = math.exp %278 : vector<8x32xf32>
    %cst_128 = arith.constant 1.000000e+00 : f32
    %280 = vector.broadcast %cst_128 : f32 to vector<8x32xf32>
    %281 = arith.addf %280, %279 : vector<8x32xf32>
    %282 = arith.divf %280, %281 : vector<8x32xf32>
    %283 = vector.extract_strided_slice %276 {offsets = [0, 32], sizes = [8, 32], strides = [1, 1]} : vector<8x128xf32> to vector<8x32xf32>
    %284 = arith.negf %283 : vector<8x32xf32>
    %285 = math.exp %284 : vector<8x32xf32>
    %cst_129 = arith.constant 1.000000e+00 : f32
    %286 = vector.broadcast %cst_129 : f32 to vector<8x32xf32>
    %287 = arith.addf %286, %285 : vector<8x32xf32>
    %288 = arith.divf %286, %287 : vector<8x32xf32>
    %289 = vector.extract_strided_slice %276 {offsets = [0, 64], sizes = [8, 32], strides = [1, 1]} : vector<8x128xf32> to vector<8x32xf32>
    %290 = math.tanh %289 : vector<8x32xf32>
    %291 = vector.extract_strided_slice %276 {offsets = [0, 96], sizes = [8, 32], strides = [1, 1]} : vector<8x128xf32> to vector<8x32xf32>
    %292 = arith.negf %291 : vector<8x32xf32>
    %293 = math.exp %292 : vector<8x32xf32>
    %cst_130 = arith.constant 1.000000e+00 : f32
    %294 = vector.broadcast %cst_130 : f32 to vector<8x32xf32>
    %295 = arith.addf %294, %293 : vector<8x32xf32>
    %296 = arith.divf %294, %295 : vector<8x32xf32>
    %297 = arith.mulf %288, %271 : vector<8x32xf32>
    %298 = arith.mulf %282, %290 : vector<8x32xf32>
    %299 = arith.addf %297, %298 : vector<8x32xf32>
    %300 = math.tanh %299 : vector<8x32xf32>
    %301 = arith.mulf %296, %300 : vector<8x32xf32>
    %c0_131 = arith.constant 0 : index
    %c0_132 = arith.constant 0 : index
    %302 = vector.load %arg7[%c0_131, %c0_132] : memref<8x32xf32, #tpu.memory_space<vmem>>, vector<8x32xf32>
    tpu.vector_store %arg7[%c0_131, %c0_132], %301 {strides = array<i32>} : memref<8x32xf32, #tpu.memory_space<vmem>>, vector<8x32xf32>,
    %c0_133 = arith.constant 0 : index
    %c0_134 = arith.constant 0 : index
    %303 = vector.load %arg8[%c0_133, %c0_134] : memref<8x32xf32, #tpu.memory_space<vmem>>, vector<8x32xf32>
    tpu.vector_store %arg8[%c0_133, %c0_134], %299 {strides = array<i32>} : memref<8x32xf32, #tpu.memory_space<vmem>>, vector<8x32xf32>,
    %304 = arith.truncf %301 : vector<8x32xf32> to vector<8x32xbf16>
    %c7_135 = arith.constant 7 : index
    %c0_136 = arith.constant 0 : index
    %c0_137 = arith.constant 0 : index
    %305 = vector.load %arg4[%c7_135, %c0_136, %c0_137] : memref<8x8x32xbf16, #tpu.memory_space<vmem>>, vector<1x8x32xbf16>
    %306 = vector.shape_cast %305 : vector<1x8x32xbf16> to vector<8x32xbf16>
    %307 = vector.shape_cast %304 : vector<8x32xbf16> to vector<1x8x32xbf16>
    tpu.vector_store %arg4[%c7_135, %c0_136, %c0_137], %307 {strides = array<i32>} : memref<8x8x32xbf16, #tpu.memory_space<vmem>>, vector<1x8x32xbf16>,
    %c0_i32_138 = arith.constant 0 : i32
    %308 = arith.cmpi eq, %arg1, %c0_i32_138 : i32
    %309 = arith.extui %308 : i1 to i32
    %c0_i32_139 = arith.constant 0 : i32
    %310 = arith.cmpi ne, %309, %c0_i32_139 : i32
    scf.if %310 {
      %c0_140 = arith.constant 0 : index
      %c0_141 = arith.constant 0 : index
      %311 = vector.load %arg7[%c0_140, %c0_141] : memref<8x32xf32, #tpu.memory_space<vmem>>, vector<8x32xf32>
      %c0_142 = arith.constant 0 : index
      %c0_143 = arith.constant 0 : index
      %312 = vector.load %arg5[%c0_142, %c0_143] : memref<8x32xf32, #tpu.memory_space<vmem>>, vector<8x32xf32>
      tpu.vector_store %arg5[%c0_142, %c0_143], %311 {strides = array<i32>} : memref<8x32xf32, #tpu.memory_space<vmem>>, vector<8x32xf32>,
      %c0_144 = arith.constant 0 : index
      %c0_145 = arith.constant 0 : index
      %313 = vector.load %arg8[%c0_144, %c0_145] : memref<8x32xf32, #tpu.memory_space<vmem>>, vector<8x32xf32>
      %c0_146 = arith.constant 0 : index
      %c0_147 = arith.constant 0 : index
      %314 = vector.load %arg6[%c0_146, %c0_147] : memref<8x32xf32, #tpu.memory_space<vmem>>, vector<8x32xf32>
      tpu.vector_store %arg6[%c0_146, %c0_147], %313 {strides = array<i32>} : memref<8x32xf32, #tpu.memory_space<vmem>>, vector<8x32xf32>,
    } else {
    }
    return
  }
  func.func @transform_0(%arg0: i32, %arg1: i32) -> (i32, i32, i32) {
    %c0_i32 = arith.constant 0 : i32
    %c0_i32_0 = arith.constant 0 : i32
    return %arg1, %arg0, %c0_i32 : i32, i32, i32
  }
  func.func @transform_1(%arg0: i32, %arg1: i32) -> (i32, i32) {
    %c0_i32 = arith.constant 0 : i32
    %c0_i32_0 = arith.constant 0 : i32
    %c0_i32_1 = arith.constant 0 : i32
    return %c0_i32, %c0_i32_0 : i32, i32
  }
  func.func @transform_2(%arg0: i32, %arg1: i32) -> (i32, i32, i32) {
    %c0_i32 = arith.constant 0 : i32
    %c0_i32_0 = arith.constant 0 : i32
    return %arg1, %arg0, %c0_i32 : i32, i32, i32
  }
  func.func @transform_3(%arg0: i32, %arg1: i32) -> (i32, i32) {
    %c0_i32 = arith.constant 0 : i32
    %c0_i32_0 = arith.constant 0 : i32
    return %arg0, %c0_i32 : i32, i32
  }
  func.func @transform_4(%arg0: i32, %arg1: i32) -> (i32, i32) {
    %c0_i32 = arith.constant 0 : i32
    %c0_i32_0 = arith.constant 0 : i32
    return %arg0, %c0_i32 : i32, i32
  }
}

</mosaic_0001>

<bundles_post_ra>
// kernel: tpu_custom_call.1
= control target key start
LH: loop header
LB: loop body
LE: loop exit
PB: predicated region body
PF: predicated region fallthrough
CT: control target
= control target key end

     0   :  { %10 = vsyncpa [#allocation5], 0  ;;  %s1506_s0 = inlined_call_operand.hbm [shape: f32[8,8,128], index: 0, kind: input, shape index: {}]   ;;  %s1507_s1 = inlined_call_operand.hbm [shape: bf16[32,128], index: 1, kind: input, shape index: {}]   ;;  %s1508_s2 = inlined_call_operand.hbm [shape: bf16[8,8,32], index: 2, kind: output, shape index: {0}]   ;;  %s1509_s3 = inlined_call_operand.hbm [shape: f32[8,32], index: 3, kind: output, shape index: {1}]   ;;  %s1510_s4 = inlined_call_operand.hbm [shape: f32[8,32], index: 4, kind: output, shape index: {2}]  }
   0x1   :  { %11 = vsyncpa [#allocation8], 0 }
   0x2   :  { %12 = vsyncpa [#allocation6], 0 }
   0x3   :  { %13 = vsyncpa [#allocation11], 0  ;;  %s1207_s15 = smov [#allocation4]   ;;  %s1089_s19 = scalar_lea.hbm %s1506_s0, 1024 }
   0x4   :  { %s19_s16 = sshll.u32 %s1207_s15, 4  ;;  %p1090_p0 = scmp.ne.s32.totalorder %s1506_s0, %s1089_s19  ;;  %s20_s16 = int_to_ptr.vmem [resolvable:$true] %s19_s16 }
   0x5   :  { %p1093_p1 = scmp.lt.u32.totalorder %s1089_s19, %s1506_s0 }
   0x7   :  { %p1095_p2 = pnand %p1093_p1, %p1090_p0 }
   0x9   :  { %1098 = shalt.err (!%p1095_p2)
}
   0xa   :  { %s1099_s24 = scalar_lea.vmem %s20_s16, 1024  ;;  %p1104_p4 = scmp.lt.s32.totalorder %s20_s16, %s20_s16 }
   0xb   :  { %p1100_p3 = scmp.ne.s32.totalorder %s20_s16, %s1099_s24  ;;  %p1105_p5 = scmp.lt.s32.totalorder %s1099_s24, %s1099_s24 }
   0xd   :  { %p1106_p6 = por %p1105_p5, %p1104_p4 }
   0xf   :  { %p1107_p7 = pnand %p1106_p6, %p1100_p3 }
  0x11   :  { %1110 = shalt.err (!%p1107_p7)
}
  0x12   :  { %s1208_s25 = smov 128   ;;  %s1209_s26 = smov 8  }
  0x13   :  { %25 = dma.hbm_to_vmem [thread:$0]  %s1506_s0, 1024, %s20_s16, [#allocation5], %s1208_s25, %s1208_s25, %s1209_s26  }
  0x14   :  { %s1210_s29 = smov [#allocation7]   ;;  %s1111_s7 = scalar_lea.hbm %s1507_s1, 256 }
  0x15   :  { %s31_s30 = sshll.u32 %s1210_s29, 4  ;;  %p1112_p8 = scmp.ne.s32.totalorder %s1507_s1, %s1111_s7  ;;  %s32_s30 = int_to_ptr.vmem [resolvable:$true] %s31_s30 }
  0x16   :  { %p1115_p9 = scmp.lt.u32.totalorder %s1111_s7, %s1507_s1 }
  0x18   :  { %p1117_p10 = pnand %p1115_p9, %p1112_p8 }
  0x1a   :  { %1120 = shalt.err (!%p1117_p10)
}
  0x1b   :  { %s1121_s12 = scalar_lea.vmem %s32_s30, 256  ;;  %p1126_p12 = scmp.lt.s32.totalorder %s32_s30, %s32_s30 }
  0x1c   :  { %p1122_p11 = scmp.ne.s32.totalorder %s32_s30, %s1121_s12  ;;  %p1127_p13 = scmp.lt.s32.totalorder %s1121_s12, %s1121_s12 }
  0x1e   :  { %p1128_p0 = por %p1127_p13, %p1126_p12 }
  0x20   :  { %p1129_p1 = pnand %p1128_p0, %p1122_p11 }
  0x22   :  { %1132 = shalt.err (!%p1129_p1)
}
  0x23   :  { %s1211_s0 = smov 64   ;;  %s1212_s13 = smov 4  }
  0x24   :  { %37 = dma.hbm_to_vmem [thread:$0]  %s1507_s1, 256, %s32_s30, [#allocation8], %s1211_s0, %s1211_s0, %s1212_s13  }
  0x25   :  { %1199 = dma.done.wait [#allocation5], 1024  }
  0x26   :  { %1200 = vsyncadd [#allocation5], 4294966272 }
  0x27   :  { %1201 = dma.done.wait [#allocation8], 256  }
  0x28   :  { %1202 = vsyncadd [#allocation8], 4294967040  ;;  %vm49_vm0 = vcmask 261120   ;;  %v1213_v0 = vmov 0.0   ;;  %vm1214_vm1 = vmmov 0   ;;  %v1282_v1 = vld [vmem:[#allocation7] sm:$0xff]  }
  0x29   :  { %946 = vmatprep.subr.bf16.mxu0 %v1213_v0  ;;  %950 = vmatprep.mubr.msk.bf16.mxu0 %vm1214_vm1, %v1213_v0  ;;  %50 = vst.msk [vmem:[#allocation2] sm:$0xff] %vm49_vm0, %v1213_v0  ;;  %51 = vst.msk [vmem:[#allocation3] sm:$0xff] %vm49_vm0, %v1213_v0  ;;  %v1285_v2 = vld [vmem:[#allocation7 + $0x8] sm:$0xff]   ;;  %v58_v5 = vld [vmem:[#allocation4] sm:$0xff]  ;;  %s1215_s1 = smov 32   ;;  %s1216_s16 = smov 96  }
  0x2a   :  { %954 = vmatprep.subr.bf16.mxu1 %v1213_v0  ;;  %958 = vmatprep.mubr.msk.bf16.mxu1 %vm1214_vm1, %v1213_v0  ;;  %v167_v31 = vld [vmem:[#allocation4 + $0x8] sm:$0xff]  ;;  %v263_v56 = vld [vmem:[#allocation4 + $0x10] sm:$0xff]  ;;  %vm162_vm2 = vcmask 257024   ;;  %s1217_s17 = smov [#allocation10]   ;;  %s1218_s19 = smov [#allocation12]  }
  0x2b   :  { %947 = vmatpush3.bf16.msra.mxu0 %v1282_v1  ;;  %955 = vmatpush3.bf16.msra.mxu1 %v1282_v1  ;;  %s861_s18 = sshll.u32 %s1217_s17, 4  ;;  %s871_s20 = sshll.u32 %s1218_s19, 4  ;;  %s862_s18 = int_to_ptr.vmem [resolvable:$true] %s861_s18  ;;  %s1450_s20 = int_to_ptr.vmem [resolvable:$true] %s871_s20 }
  0x2c   :  { %948 = vmatprep.subr.bf16.mxu0 %v1213_v0  ;;  %956 = vmatprep.subr.bf16.mxu1 %v1213_v0  ;;  %s1219_s21 = smov [#allocation9]   ;;  %s1133_s23 = scalar_lea.vmem %s862_s18, 128 }
  0x2d   :  { %s848_s22 = sshll.u32 %s1219_s21, 4  ;;  %p1134_p2 = scmp.ne.s32.totalorder %s862_s18, %s1133_s23  ;;  %s1454_s22 = int_to_ptr.vmem [resolvable:$true] %s848_s22 }
  0x2e   :  { %p1138_p3 = scmp.lt.s32.totalorder %s862_s18, %s862_s18  ;;  %p1139_p4 = scmp.lt.s32.totalorder %s1133_s23, %s1133_s23 }
  0x2f   :  { %949 = vmatpush3.bf16.msra.mxu0 %v1285_v2  ;;  %957 = vmatpush3.bf16.msra.mxu1 %v1285_v2 }
  0x30   :  { %v56_v3 = vld [vmem:[#allocation2] sm:$0xff]  ;;  %962 = vmatprep.subr.bf16.mxu0 %v1213_v0  ;;  %970 = vmatprep.subr.bf16.mxu1 %v1213_v0  ;;  %v57_v12 = vld [vmem:[#allocation3] sm:$0xff]  ;;  %p1140_p5 = por %p1139_p4, %p1138_p3 }
  0x31   :  { %v59_v4 = vpack.c.bf16 %v56_v3, %v56_v3 }
  0x32   :  { %p1141_p6 = pnand %p1140_p5, %p1134_p2 }
  0x33   :  { %951 = vmatmul.mubr.msk.bf16.vlgmr.msra.gmra.mrb[0].mxu0 %vm49_vm0, %v59_v4 }
  0x34   :  { %963 = vmatpush3.bf16.msra.mxu0 %v1282_v1  ;;  %966 = vmatprep.mubr.msk.bf16.mxu0 %vm1214_vm1, %v1213_v0 }
  0x35   :  { %964 = vmatprep.subr.bf16.mxu0 %v1213_v0 }
  0x38   :  { %965 = vmatpush3.bf16.msra.mxu0 %v1285_v2 }
  0x39   :  { %978 = vmatprep.subr.bf16.mxu0 %v1213_v0 }
 0x106   :  { %v110_v6 = vpop.f32.mrb[0].mxu0 }
 0x107   :  { %v116_v7 = vadd.f32 %v110_v6, %v58_v5  ;;  %v952_v8 = vpop.f32.mrb[1].mxu0 }
 0x108   :  { %v113_v9 = vpop.f32.mrb[2].mxu0 }
 0x109   :  { %v953_v10 = vpop.f32.mrb[3].mxu0  ;;  %1025 = vtanh.f32 %v116_v7  ;;  %v891_v13 = vmul.f32 -1.442695, %v116_v7 }
 0x10b   :  { %1027 = vpow2.f32 %v891_v13 }
 0x113   :  { %v1026_v11 = vpop.eup %1025 }
 0x114   :  { %130 = vrot.lane.b32.xlu0 %v1026_v11, %s1211_s0 }
 0x115   :  { %v1028_v14 = vpop.eup %1027 }
 0x116   :  { %v120_v15 = vadd.f32 1.0, %v1028_v14 }
 0x118   :  { %125 = vrot.lane.b32.xlu0 %v57_v12, %s1215_s1  ;;  %1029 = vrcp.f32 %v120_v15 }
 0x122   :  { %v1030_v16 = vpop.eup %1029 }
 0x186   :  { %v131_v17 = vpop.permute.xlu0 %130 }
 0x187   :  { %v133_v18 = vmul.f32 %v1030_v16, %v131_v17 }
 0x189   :  { %135 = vrot.lane.b32.xlu1 %v133_v18, %s1215_s1 }
 0x18a   :  { %v126_v19 = vpop.permute.xlu0 %125 }
 0x18b   :  { %v128_v20 = vmul.f32 %v1030_v16, %v126_v19 }
 0x1fb   :  { %v136_v21 = vpop.permute.xlu1 %135 }
 0x1fc   :  { %v138_v22 = vadd.f32 %v136_v21, %v128_v20  ;;  %v359_v20 = vld [vmem:[#allocation4 + $0x18] sm:$0xff] }
 0x1fe   :  { %1031 = vtanh.f32 %v138_v22 }
 0x208   :  { %v1032_v23 = vpop.eup %1031 }
 0x209   :  { %141 = vrot.lane.b32.xlu1 %v1032_v23, %s1211_s0 }
 0x20d   :  { %151 = vrot.lane.b32.xlu1 %v138_v22, %s1216_s16 }
 0x27b   :  { %v142_v24 = vpop.permute.xlu1 %141 }
 0x27c   :  { %v1306_v25 = vmul.f32 %v1030_v16, %v142_v24 }
 0x27e   :  { %146 = vrot.lane.b32.xlu0 %v1306_v25, %s1215_s1 }
 0x27f   :  { %v152_v26 = vpop.permute.xlu1 %151 }
 0x280   :  { %154 = vst.msk [vmem:[#allocation3] sm:$0xff] %vm49_vm0, %v152_v26 }
 0x287   :  { %v165_v27 = vld [vmem:[#allocation3] sm:$0xff] }
 0x288   :  { %221 = vrot.lane.b32.xlu1 %v165_v27, %s1215_s1 }
 0x2f0   :  { %v147_v28 = vpop.permute.xlu0 %146 }
 0x2f1   :  { %149 = vst.msk [vmem:[#allocation2] sm:$0xff] %vm49_vm0, %v147_v28 }
 0x2f8   :  { %v164_v29 = vld [vmem:[#allocation2] sm:$0xff] }
 0x2f9   :  { %v168_v30 = vpack.c.bf16 %v164_v29, %v164_v29 }
 0x2fa   :  { %v222_v44 = vpop.permute.xlu1 %221 }
 0x2fb   :  { %959 = vmatmul.mubr.msk.bf16.vlgmr.msra.gmra.mrb[0].mxu1 %vm49_vm0, %v168_v30 }
 0x2fc   :  { %971 = vmatpush3.bf16.msra.mxu1 %v1282_v1  ;;  %974 = vmatprep.mubr.msk.bf16.mxu1 %vm1214_vm1, %v1213_v0 }
 0x2fd   :  { %972 = vmatprep.subr.bf16.mxu1 %v1213_v0 }
 0x300   :  { %973 = vmatpush3.bf16.msra.mxu1 %v1285_v2 }
 0x301   :  { %986 = vmatprep.subr.bf16.mxu1 %v1213_v0 }
 0x3ce   :  { %v206_v32 = vpop.f32.mrb[0].mxu1 }
 0x3cf   :  { %v212_v33 = vadd.f32 %v206_v32, %v167_v31  ;;  %v960_v34 = vpop.f32.mrb[1].mxu1 }
 0x3d0   :  { %v209_v35 = vpop.f32.mrb[2].mxu1 }
 0x3d1   :  { %1033 = vtanh.f32 %v212_v33  ;;  %v961_v36 = vpop.f32.mrb[3].mxu1  ;;  %v894_v38 = vmul.f32 -1.442695, %v212_v33 }
 0x3d3   :  { %1035 = vpow2.f32 %v894_v38 }
 0x3db   :  { %v1034_v37 = vpop.eup %1033 }
 0x3dc   :  { %226 = vrot.lane.b32.xlu0 %v1034_v37, %s1211_s0 }
 0x3dd   :  { %v1036_v39 = vpop.eup %1035 }
 0x3de   :  { %v216_v40 = vadd.f32 1.0, %v1036_v39 }
 0x3e0   :  { %1037 = vrcp.f32 %v216_v40 }
 0x3ea   :  { %v1038_v41 = vpop.eup %1037 }
 0x3eb   :  { %v224_v45 = vmul.f32 %v1038_v41, %v222_v44 }
 0x44e   :  { %v227_v42 = vpop.permute.xlu0 %226 }
 0x44f   :  { %v229_v43 = vmul.f32 %v1038_v41, %v227_v42 }
 0x451   :  { %231 = vrot.lane.b32.xlu0 %v229_v43, %s1215_s1 }
 0x4c3   :  { %v232_v46 = vpop.permute.xlu0 %231 }
 0x4c4   :  { %v234_v47 = vadd.f32 %v232_v46, %v224_v45  ;;  %v455_v46 = vld [vmem:[#allocation4 + $0x20] sm:$0xff] }
 0x4c6   :  { %1039 = vtanh.f32 %v234_v47 }
 0x4d0   :  { %v1040_v48 = vpop.eup %1039 }
 0x4d1   :  { %237 = vrot.lane.b32.xlu1 %v1040_v48, %s1211_s0 }
 0x4d5   :  { %247 = vrot.lane.b32.xlu1 %v234_v47, %s1216_s16 }
 0x543   :  { %v238_v49 = vpop.permute.xlu1 %237 }
 0x544   :  { %v1324_v50 = vmul.f32 %v1038_v41, %v238_v49 }
 0x546   :  { %242 = vrot.lane.b32.xlu0 %v1324_v50, %s1215_s1 }
 0x547   :  { %v248_v51 = vpop.permute.xlu1 %247 }
 0x548   :  { %250 = vst.msk [vmem:[#allocation3] sm:$0xff] %vm49_vm0, %v248_v51 }
 0x54f   :  { %v261_v52 = vld [vmem:[#allocation3] sm:$0xff] }
 0x550   :  { %317 = vrot.lane.b32.xlu1 %v261_v52, %s1215_s1 }
 0x5b8   :  { %v243_v53 = vpop.permute.xlu0 %242 }
 0x5b9   :  { %245 = vst.msk [vmem:[#allocation2] sm:$0xff] %vm49_vm0, %v243_v53 }
 0x5c0   :  { %v260_v54 = vld [vmem:[#allocation2] sm:$0xff] }
 0x5c1   :  { %v264_v55 = vpack.c.bf16 %v260_v54, %v260_v54 }
 0x5c2   :  { %v318_v8 = vpop.permute.xlu1 %317 }
 0x5c3   :  { %967 = vmatmul.mubr.msk.bf16.vlgmr.msra.gmra.mrb[4].mxu0 %vm49_vm0, %v264_v55 }
 0x5c4   :  { %979 = vmatpush3.bf16.msra.mxu0 %v1282_v1  ;;  %982 = vmatprep.mubr.msk.bf16.mxu0 %vm1214_vm1, %v1213_v0 }
 0x5c5   :  { %980 = vmatprep.subr.bf16.mxu0 %v1213_v0 }
 0x5c8   :  { %981 = vmatpush3.bf16.msra.mxu0 %v1285_v2 }
 0x5c9   :  { %994 = vmatprep.subr.bf16.mxu0 %v1213_v0 }
 0x696   :  { %v302_v57 = vpop.f32.mrb[4].mxu0 }
 0x697   :  { %v308_v58 = vadd.f32 %v302_v57, %v263_v56  ;;  %v968_v59 = vpop.f32.mrb[5].mxu0 }
 0x698   :  { %v305_v60 = vpop.f32.mrb[6].mxu0 }
 0x699   :  { %1041 = vtanh.f32 %v308_v58  ;;  %v969_v61 = vpop.f32.mrb[7].mxu0  ;;  %v897_v63 = vmul.f32 -1.442695, %v308_v58 }
 0x69b   :  { %1043 = vpow2.f32 %v897_v63 }
 0x6a3   :  { %v1042_v62 = vpop.eup %1041 }
 0x6a4   :  { %322 = vrot.lane.b32.xlu0 %v1042_v62, %s1211_s0 }
 0x6a5   :  { %v1044_v3 = vpop.eup %1043 }
 0x6a6   :  { %v312_v4 = vadd.f32 1.0, %v1044_v3 }
 0x6a8   :  { %1045 = vrcp.f32 %v312_v4 }
 0x6b2   :  { %v1046_v5 = vpop.eup %1045 }
 0x6b3   :  { %v320_v9 = vmul.f32 %v1046_v5, %v318_v8 }
 0x716   :  { %v323_v6 = vpop.permute.xlu0 %322 }
 0x717   :  { %v325_v7 = vmul.f32 %v1046_v5, %v323_v6 }
 0x719   :  { %327 = vrot.lane.b32.xlu0 %v325_v7, %s1215_s1 }
 0x78b   :  { %v328_v10 = vpop.permute.xlu0 %327 }
 0x78c   :  { %v330_v11 = vadd.f32 %v328_v10, %v320_v9 }
 0x78e   :  { %1047 = vtanh.f32 %v330_v11 }
 0x798   :  { %v1048_v12 = vpop.eup %1047 }
 0x799   :  { %333 = vrot.lane.b32.xlu1 %v1048_v12, %s1211_s0 }
 0x79d   :  { %343 = vrot.lane.b32.xlu1 %v330_v11, %s1216_s16  ;;  %v551_v11 = vld [vmem:[#allocation4 + $0x28] sm:$0xff] }
 0x80b   :  { %v334_v13 = vpop.permute.xlu1 %333 }
 0x80c   :  { %v1342_v14 = vmul.f32 %v1046_v5, %v334_v13 }
 0x80e   :  { %338 = vrot.lane.b32.xlu0 %v1342_v14, %s1215_s1 }
 0x80f   :  { %v344_v15 = vpop.permute.xlu1 %343 }
 0x810   :  { %346 = vst.msk [vmem:[#allocation3] sm:$0xff] %vm49_vm0, %v344_v15 }
 0x817   :  { %v357_v16 = vld [vmem:[#allocation3] sm:$0xff] }
 0x818   :  { %413 = vrot.lane.b32.xlu1 %v357_v16, %s1215_s1 }
 0x880   :  { %v339_v17 = vpop.permute.xlu0 %338 }
 0x881   :  { %341 = vst.msk [vmem:[#allocation2] sm:$0xff] %vm49_vm0, %v339_v17 }
 0x888   :  { %v356_v18 = vld [vmem:[#allocation2] sm:$0xff] }
 0x889   :  { %v360_v19 = vpack.c.bf16 %v356_v18, %v356_v18 }
 0x88a   :  { %v414_v34 = vpop.permute.xlu1 %413 }
 0x88b   :  { %975 = vmatmul.mubr.msk.bf16.vlgmr.msra.gmra.mrb[4].mxu1 %vm49_vm0, %v360_v19 }
 0x88c   :  { %987 = vmatpush3.bf16.msra.mxu1 %v1282_v1  ;;  %990 = vmatprep.mubr.msk.bf16.mxu1 %vm1214_vm1, %v1213_v0 }
 0x88d   :  { %988 = vmatprep.subr.bf16.mxu1 %v1213_v0 }
 0x890   :  { %989 = vmatpush3.bf16.msra.mxu1 %v1285_v2 }
 0x891   :  { %1002 = vmatprep.subr.bf16.mxu1 %v1213_v0 }
 0x95e   :  { %v398_v21 = vpop.f32.mrb[4].mxu1 }
 0x95f   :  { %v404_v22 = vadd.f32 %v398_v21, %v359_v20  ;;  %v976_v23 = vpop.f32.mrb[5].mxu1 }
 0x960   :  { %v401_v24 = vpop.f32.mrb[6].mxu1 }
 0x961   :  { %1049 = vtanh.f32 %v404_v22  ;;  %v977_v26 = vpop.f32.mrb[7].mxu1  ;;  %v900_v28 = vmul.f32 -1.442695, %v404_v22 }
 0x963   :  { %1051 = vpow2.f32 %v900_v28 }
 0x96b   :  { %v1050_v27 = vpop.eup %1049 }
 0x96c   :  { %418 = vrot.lane.b32.xlu0 %v1050_v27, %s1211_s0 }
 0x96d   :  { %v1052_v29 = vpop.eup %1051 }
 0x96e   :  { %v408_v30 = vadd.f32 1.0, %v1052_v29 }
 0x970   :  { %1053 = vrcp.f32 %v408_v30 }
 0x97a   :  { %v1054_v31 = vpop.eup %1053 }
 0x97b   :  { %v416_v35 = vmul.f32 %v1054_v31, %v414_v34 }
 0x9de   :  { %v419_v32 = vpop.permute.xlu0 %418 }
 0x9df   :  { %v421_v33 = vmul.f32 %v1054_v31, %v419_v32 }
 0x9e1   :  { %423 = vrot.lane.b32.xlu0 %v421_v33, %s1215_s1 }
 0xa53   :  { %v424_v36 = vpop.permute.xlu0 %423 }
 0xa54   :  { %v426_v37 = vadd.f32 %v424_v36, %v416_v35  ;;  %v647_v35 = vld [vmem:[#allocation4 + $0x30] sm:$0xff] }
 0xa56   :  { %1055 = vtanh.f32 %v426_v37 }
 0xa60   :  { %v1056_v38 = vpop.eup %1055 }
 0xa61   :  { %429 = vrot.lane.b32.xlu1 %v1056_v38, %s1211_s0 }
 0xa65   :  { %439 = vrot.lane.b32.xlu1 %v426_v37, %s1216_s16 }
 0xad3   :  { %v430_v39 = vpop.permute.xlu1 %429 }
 0xad4   :  { %v1360_v40 = vmul.f32 %v1054_v31, %v430_v39 }
 0xad6   :  { %434 = vrot.lane.b32.xlu0 %v1360_v40, %s1215_s1 }
 0xad7   :  { %v440_v41 = vpop.permute.xlu1 %439 }
 0xad8   :  { %442 = vst.msk [vmem:[#allocation3] sm:$0xff] %vm49_vm0, %v440_v41 }
 0xadf   :  { %v453_v42 = vld [vmem:[#allocation3] sm:$0xff] }
 0xae0   :  { %509 = vrot.lane.b32.xlu1 %v453_v42, %s1215_s1 }
 0xb48   :  { %v435_v43 = vpop.permute.xlu0 %434 }
 0xb49   :  { %437 = vst.msk [vmem:[#allocation2] sm:$0xff] %vm49_vm0, %v435_v43 }
 0xb50   :  { %v452_v44 = vld [vmem:[#allocation2] sm:$0xff] }
 0xb51   :  { %v456_v45 = vpack.c.bf16 %v452_v44, %v452_v44 }
 0xb52   :  { %v510_v60 = vpop.permute.xlu1 %509 }
 0xb53   :  { %983 = vmatmul.mubr.msk.bf16.vlgmr.msra.gmra.mrb[8].mxu0 %vm49_vm0, %v456_v45 }
 0xb54   :  { %995 = vmatpush3.bf16.msra.mxu0 %v1282_v1  ;;  %998 = vmatprep.mubr.msk.bf16.mxu0 %vm1214_vm1, %v1213_v0 }
 0xb55   :  { %996 = vmatprep.subr.bf16.mxu0 %v1213_v0 }
 0xb58   :  { %997 = vmatpush3.bf16.msra.mxu0 %v1285_v2 }
 0xc26   :  { %v494_v47 = vpop.f32.mrb[8].mxu0 }
 0xc27   :  { %v500_v48 = vadd.f32 %v494_v47, %v455_v46  ;;  %v984_v49 = vpop.f32.mrb[9].mxu0 }
 0xc28   :  { %v497_v51 = vpop.f32.mrb[10].mxu0 }
 0xc29   :  { %1057 = vtanh.f32 %v500_v48  ;;  %v985_v52 = vpop.f32.mrb[11].mxu0  ;;  %v903_v54 = vmul.f32 -1.442695, %v500_v48 }
 0xc2b   :  { %1059 = vpow2.f32 %v903_v54 }
 0xc33   :  { %v1058_v53 = vpop.eup %1057 }
 0xc34   :  { %514 = vrot.lane.b32.xlu0 %v1058_v53, %s1211_s0 }
 0xc35   :  { %v1060_v55 = vpop.eup %1059 }
 0xc36   :  { %v504_v56 = vadd.f32 1.0, %v1060_v55 }
 0xc38   :  { %1061 = vrcp.f32 %v504_v56 }
 0xc42   :  { %v1062_v57 = vpop.eup %1061 }
 0xc43   :  { %v512_v61 = vmul.f32 %v1062_v57, %v510_v60 }
 0xca6   :  { %v515_v58 = vpop.permute.xlu0 %514 }
 0xca7   :  { %v517_v59 = vmul.f32 %v1062_v57, %v515_v58 }
 0xca9   :  { %519 = vrot.lane.b32.xlu0 %v517_v59, %s1215_s1 }
 0xd1b   :  { %v520_v62 = vpop.permute.xlu0 %519 }
 0xd1c   :  { %v522_v63 = vadd.f32 %v520_v62, %v512_v61  ;;  %v743_v62 = vld [vmem:[#allocation4 + $0x38] sm:$0xff] }
 0xd1e   :  { %1063 = vtanh.f32 %v522_v63 }
 0xd28   :  { %v1064_v3 = vpop.eup %1063 }
 0xd29   :  { %525 = vrot.lane.b32.xlu1 %v1064_v3, %s1211_s0 }
 0xd2d   :  { %535 = vrot.lane.b32.xlu1 %v522_v63, %s1216_s16 }
 0xd9b   :  { %v526_v4 = vpop.permute.xlu1 %525 }
 0xd9c   :  { %v1377_v5 = vmul.f32 %v1062_v57, %v526_v4 }
 0xd9e   :  { %530 = vrot.lane.b32.xlu0 %v1377_v5, %s1215_s1 }
 0xd9f   :  { %v536_v6 = vpop.permute.xlu1 %535 }
 0xda0   :  { %538 = vst.msk [vmem:[#allocation3] sm:$0xff] %vm49_vm0, %v536_v6 }
 0xda7   :  { %v549_v7 = vld [vmem:[#allocation3] sm:$0xff] }
 0xda8   :  { %605 = vrot.lane.b32.xlu1 %v549_v7, %s1215_s1 }
 0xe10   :  { %v531_v8 = vpop.permute.xlu0 %530 }
 0xe11   :  { %533 = vst.msk [vmem:[#allocation2] sm:$0xff] %vm49_vm0, %v531_v8 }
 0xe18   :  { %v548_v9 = vld [vmem:[#allocation2] sm:$0xff] }
 0xe19   :  { %v552_v10 = vpack.c.bf16 %v548_v9, %v548_v9 }
 0xe1b   :  { %991 = vmatmul.mubr.msk.bf16.vlgmr.msra.gmra.mrb[8].mxu1 %vm49_vm0, %v552_v10 }
 0xe1c   :  { %1003 = vmatpush3.bf16.msra.mxu1 %v1282_v1  ;;  %1006 = vmatprep.mubr.msk.bf16.mxu1 %vm1214_vm1, %v1213_v0 }
 0xe1d   :  { %1004 = vmatprep.subr.bf16.mxu1 %v1213_v0 }
 0xe20   :  { %1005 = vmatpush3.bf16.msra.mxu1 %v1285_v2  ;;  %v606_v2 = vpop.permute.xlu1 %605 }
 0xeee   :  { %v590_v12 = vpop.f32.mrb[8].mxu1 }
 0xeef   :  { %v596_v13 = vadd.f32 %v590_v12, %v551_v11  ;;  %v992_v15 = vpop.f32.mrb[9].mxu1 }
 0xef0   :  { %v593_v16 = vpop.f32.mrb[10].mxu1 }
 0xef1   :  { %1065 = vtanh.f32 %v596_v13  ;;  %v993_v17 = vpop.f32.mrb[11].mxu1  ;;  %v906_v19 = vmul.f32 -1.442695, %v596_v13  ;;  %v914_v16 = vpack.c.bf16 %v1306_v25, %v1306_v25  ;;  %v917_v25 = vpack.c.bf16 %v1360_v40, %v1360_v40 }
 0xef3   :  { %1067 = vpow2.f32 %v906_v19 }
 0xefb   :  { %v1066_v18 = vpop.eup %1065 }
 0xefc   :  { %610 = vrot.lane.b32.xlu0 %v1066_v18, %s1211_s0 }
 0xefd   :  { %v1068_v1 = vpop.eup %1067 }
 0xefe   :  { %v600_v20 = vadd.f32 1.0, %v1068_v1 }
 0xf00   :  { %1069 = vrcp.f32 %v600_v20 }
 0xf0a   :  { %v1070_v21 = vpop.eup %1069 }
 0xf0b   :  { %v608_v23 = vmul.f32 %v1070_v21, %v606_v2 }
 0xf6e   :  { %v611_v22 = vpop.permute.xlu0 %610 }
 0xf6f   :  { %v613_v0 = vmul.f32 %v1070_v21, %v611_v22  ;;  %v915_v22 = vpack.c.bf16 %v1324_v50, %v1324_v50  ;;  %v916_v50 = vpack.c.bf16 %v1342_v14, %v1342_v14 }
 0xf71   :  { %615 = vrot.lane.b32.xlu0 %v613_v0, %s1215_s1 }
 0xfe3   :  { %v616_v24 = vpop.permute.xlu0 %615 }
 0xfe4   :  { %v618_v26 = vadd.f32 %v616_v24, %v608_v23 }
 0xfe6   :  { %1071 = vtanh.f32 %v618_v26 }
 0xff0   :  { %v1072_v27 = vpop.eup %1071 }
 0xff1   :  { %621 = vrot.lane.b32.xlu1 %v1072_v27, %s1211_s0  ;;  %v918_v27 = vpack.c.bf16 %v1377_v5, %v1377_v5 }
 0xff5   :  { %631 = vrot.lane.b32.xlu1 %v618_v26, %s1216_s16 }
0x1063   :  { %v622_v28 = vpop.permute.xlu1 %621 }
0x1064   :  { %v1394_v29 = vmul.f32 %v1070_v21, %v622_v28 }
0x1066   :  { %626 = vrot.lane.b32.xlu0 %v1394_v29, %s1215_s1  ;;  %v919_v0 = vpack.c.bf16 %v1394_v29, %v1394_v29 }
0x1067   :  { %v632_v30 = vpop.permute.xlu1 %631 }
0x1068   :  { %634 = vst.msk [vmem:[#allocation3] sm:$0xff] %vm49_vm0, %v632_v30 }
0x106f   :  { %v645_v31 = vld [vmem:[#allocation3] sm:$0xff] }
0x1070   :  { %701 = vrot.lane.b32.xlu1 %v645_v31, %s1215_s1 }
0x10d8   :  { %v627_v32 = vpop.permute.xlu0 %626 }
0x10d9   :  { %629 = vst.msk [vmem:[#allocation2] sm:$0xff] %vm49_vm0, %v627_v32 }
0x10e0   :  { %v644_v33 = vld [vmem:[#allocation2] sm:$0xff] }
0x10e1   :  { %v648_v34 = vpack.c.bf16 %v644_v33, %v644_v33 }
0x10e2   :  { %v702_v49 = vpop.permute.xlu1 %701 }
0x10e3   :  { %999 = vmatmul.mubr.msk.bf16.vlgmr.msra.gmra.mrb[12].mxu0 %vm49_vm0, %v648_v34 }
0x11b6   :  { %v686_v36 = vpop.f32.mrb[12].mxu0 }
0x11b7   :  { %v692_v37 = vadd.f32 %v686_v36, %v647_v35  ;;  %v1000_v38 = vpop.f32.mrb[13].mxu0 }
0x11b8   :  { %v689_v39 = vpop.f32.mrb[14].mxu0 }
0x11b9   :  { %1073 = vtanh.f32 %v692_v37  ;;  %v1001_v41 = vpop.f32.mrb[15].mxu0  ;;  %v909_v43 = vmul.f32 -1.442695, %v692_v37 }
0x11bb   :  { %1075 = vpow2.f32 %v909_v43 }
0x11c3   :  { %v1074_v42 = vpop.eup %1073 }
0x11c4   :  { %706 = vrot.lane.b32.xlu0 %v1074_v42, %s1211_s0 }
0x11c5   :  { %v1076_v44 = vpop.eup %1075 }
0x11c6   :  { %v696_v45 = vadd.f32 1.0, %v1076_v44 }
0x11c8   :  { %1077 = vrcp.f32 %v696_v45 }
0x11d2   :  { %v1078_v46 = vpop.eup %1077 }
0x11d3   :  { %v704_v51 = vmul.f32 %v1078_v46, %v702_v49 }
0x1236   :  { %v707_v47 = vpop.permute.xlu0 %706 }
0x1237   :  { %v709_v48 = vmul.f32 %v1078_v46, %v707_v47 }
0x1239   :  { %711 = vrot.lane.b32.xlu0 %v709_v48, %s1215_s1 }
0x12ab   :  { %v712_v52 = vpop.permute.xlu0 %711 }
0x12ac   :  { %v714_v53 = vadd.f32 %v712_v52, %v704_v51 }
0x12ae   :  { %1079 = vtanh.f32 %v714_v53 }
0x12b8   :  { %v1080_v54 = vpop.eup %1079 }
0x12b9   :  { %717 = vrot.lane.b32.xlu1 %v1080_v54, %s1211_s0 }
0x12bd   :  { %727 = vrot.lane.b32.xlu1 %v714_v53, %s1216_s16 }
0x132b   :  { %v718_v55 = vpop.permute.xlu1 %717 }
0x132c   :  { %v1406_v56 = vmul.f32 %v1078_v46, %v718_v55 }
0x132e   :  { %722 = vrot.lane.b32.xlu0 %v1406_v56, %s1215_s1  ;;  %v920_v30 = vpack.c.bf16 %v1406_v56, %v1406_v56 }
0x132f   :  { %v728_v57 = vpop.permute.xlu1 %727 }
0x1330   :  { %730 = vst.msk [vmem:[#allocation3] sm:$0xff] %vm49_vm0, %v728_v57 }
0x1337   :  { %v741_v58 = vld [vmem:[#allocation3] sm:$0xff] }
0x1338   :  { %797 = vrot.lane.b32.xlu1 %v741_v58, %s1215_s1 }
0x13a0   :  { %v723_v59 = vpop.permute.xlu0 %722 }
0x13a1   :  { %725 = vst.msk [vmem:[#allocation2] sm:$0xff] %vm49_vm0, %v723_v59 }
0x13a8   :  { %v740_v60 = vld [vmem:[#allocation2] sm:$0xff] }
0x13a9   :  { %v744_v61 = vpack.c.bf16 %v740_v60, %v740_v60 }
0x13aa   :  { %v798_v17 = vpop.permute.xlu1 %797 }
0x13ab   :  { %1007 = vmatmul.mubr.msk.bf16.vlgmr.msra.gmra.mrb[12].mxu1 %vm49_vm0, %v744_v61 }
0x147e   :  { %v782_v63 = vpop.f32.mrb[12].mxu1 }
0x147f   :  { %v788_v3 = vadd.f32 %v782_v63, %v743_v62  ;;  %v1008_v4 = vpop.f32.mrb[13].mxu1 }
0x1480   :  { %v785_v6 = vpop.f32.mrb[14].mxu1 }
0x1481   :  { %1081 = vtanh.f32 %v788_v3  ;;  %v1009_v7 = vpop.f32.mrb[15].mxu1  ;;  %v912_v9 = vmul.f32 -1.442695, %v788_v3 }
0x1483   :  { %1083 = vpow2.f32 %v912_v9 }
0x148b   :  { %v1082_v8 = vpop.eup %1081 }
0x148c   :  { %802 = vrot.lane.b32.xlu0 %v1082_v8, %s1211_s0 }
0x148d   :  { %v1084_v10 = vpop.eup %1083 }
0x148e   :  { %v792_v11 = vadd.f32 1.0, %v1084_v10 }
0x1490   :  { %1085 = vrcp.f32 %v792_v11 }
0x149a   :  { %v1086_v12 = vpop.eup %1085 }
0x149b   :  { %v800_v18 = vmul.f32 %v1086_v12, %v798_v17 }
0x14fe   :  { %v803_v13 = vpop.permute.xlu0 %802 }
0x14ff   :  { %v805_v15 = vmul.f32 %v1086_v12, %v803_v13 }
0x1501   :  { %807 = vrot.lane.b32.xlu0 %v805_v15, %s1215_s1 }
0x1505   :  { %159 = vrot.lane.b32.xlu0 %v914_v16, %s1215_s1 }
0x1573   :  { %v808_v19 = vpop.permute.xlu0 %807 }
0x1574   :  { %v810_v1 = vadd.f32 %v808_v19, %v800_v18 }
0x1576   :  { %1087 = vtanh.f32 %v810_v1 }
0x1577   :  { %v160_v20 = vpop.permute.xlu0 %159 }
0x1578   :  { %163 = vst.msk [vmem:[#allocation9] sm:$0xf] %vm162_vm2, %v160_v20 }
0x1580   :  { %v1088_v21 = vpop.eup %1087 }
0x1581   :  { %813 = vrot.lane.b32.xlu1 %v1088_v21, %s1211_s0 }
0x1585   :  { %823 = vrot.lane.b32.xlu1 %v810_v1, %s1216_s16 }
0x1589   :  { %255 = vrot.lane.b32.xlu1 %v915_v22, %s1215_s1 }
0x158d   :  { %447 = vrot.lane.b32.xlu1 %v917_v25, %s1215_s1 }
0x1591   :  { %639 = vrot.lane.b32.xlu1 %v919_v0, %s1215_s1 }
0x15f3   :  { %v814_v2 = vpop.permute.xlu1 %813 }
0x15f4   :  { %v816_v23 = vmul.f32 %v1086_v12, %v814_v2 }
0x15f6   :  { %v921_v24 = vpack.c.bf16 %v816_v23, %v816_v23  ;;  %818 = vrot.lane.b32.xlu0 %v816_v23, %s1215_s1 }
0x15f7   :  { %v824_v26 = vpop.permute.xlu1 %823 }
0x15f8   :  { %826 = vst.msk [vmem:[#allocation3] sm:$0xff] %vm49_vm0, %v824_v26  ;;  %831 = vrot.lane.b32.xlu1 %v921_v24, %s1215_s1 }
0x15fa   :  { %351 = vrot.lane.b32.xlu0 %v916_v50, %s1215_s1 }
0x15fb   :  { %v256_v40 = vpop.permute.xlu1 %255 }
0x15fc   :  { %259 = vst.msk [vmem:[#allocation9 + $0x4] sm:$0xf] %vm162_vm2, %v256_v40 }
0x15fe   :  { %543 = vrot.lane.b32.xlu0 %v918_v27, %s1215_s1 }
0x15ff   :  { %v448_v28 = vpop.permute.xlu1 %447  ;;  %v841_v29 = vld [vmem:[#allocation3] sm:$0xff] }
0x1600   :  { %451 = vst.msk [vmem:[#allocation9 + $0xc] sm:$0xf] %vm162_vm2, %v448_v28 }
0x1601   :  { %842 = vst.msk [vmem:[#allocation12] sm:$0xff] %vm49_vm0, %v841_v29 }
0x1602   :  { %735 = vrot.lane.b32.xlu0 %v920_v30, %s1215_s1 }
0x1603   :  { %v640_v14 = vpop.permute.xlu1 %639 }
0x1604   :  { %643 = vst.msk [vmem:[#allocation9 + $0x14] sm:$0xf] %vm162_vm2, %v640_v14 }
0x1668   :  { %v819_v31 = vpop.permute.xlu0 %818 }
0x1669   :  { %821 = vst.msk [vmem:[#allocation2] sm:$0xff] %vm49_vm0, %v819_v31 }
0x166a   :  { %v832_v5 = vpop.permute.xlu1 %831 }
0x166b   :  { %835 = vst.msk [vmem:[#allocation9 + $0x1c] sm:$0xf] %vm162_vm2, %v832_v5 }
0x166c   :  { %v352_v32 = vpop.permute.xlu0 %351 }
0x166d   :  { %355 = vst.msk [vmem:[#allocation9 + $0x8] sm:$0xf] %vm162_vm2, %v352_v32 }
0x1670   :  { %v544_v33 = vpop.permute.xlu0 %543  ;;  %v839_v34 = vld [vmem:[#allocation2] sm:$0xff] }
0x1671   :  { %547 = vst.msk [vmem:[#allocation9 + $0x10] sm:$0xf] %vm162_vm2, %v544_v33 }
0x1672   :  { %840 = vst.msk [vmem:[#allocation10] sm:$0xff] %vm49_vm0, %v839_v34 }
0x1673   :  { %1144 = shalt.err (!%p1141_p6)
}
0x1674   :  { %s1145_s26 = scalar_lea.hbm %s1509_s3, 128 }
0x1675   :  { %p1146_p7 = scmp.ne.s32.totalorder %s1509_s3, %s1145_s26  ;;  %p1149_p8 = scmp.lt.u32.totalorder %s1145_s26, %s1509_s3 }
0x1677   :  { %p1151_p9 = pnand %p1149_p8, %p1146_p7 }
0x1679   :  { %1154 = shalt.err (!%p1151_p9)
}
0x167a   :  { %864 = dma.vmem_to_hbm [thread:$0]  %s862_s18, 128, %s1509_s3, [#allocation11]  }
0x167b   :  { %s1155_s7 = scalar_lea.vmem %s1450_s20, 128  ;;  %p1160_p11 = scmp.lt.s32.totalorder %s1450_s20, %s1450_s20 }
0x167c   :  { %p1156_p10 = scmp.ne.s32.totalorder %s1450_s20, %s1155_s7  ;;  %p1161_p12 = scmp.lt.s32.totalorder %s1155_s7, %s1155_s7 }
0x167e   :  { %p1162_p13 = por %p1161_p12, %p1160_p11 }
0x1680   :  { %p1163_p0 = pnand %p1162_p13, %p1156_p10 }
0x1682   :  { %1166 = shalt.err (!%p1163_p0)
}
0x1683   :  { %s1167_s10 = scalar_lea.hbm %s1510_s4, 128 }
0x1684   :  { %p1168_p1 = scmp.ne.s32.totalorder %s1510_s4, %s1167_s10  ;;  %p1171_p2 = scmp.lt.u32.totalorder %s1167_s10, %s1510_s4 }
0x1686   :  { %p1173_p3 = pnand %p1171_p2, %p1168_p1 }
0x1688   :  { %1176 = shalt.err (!%p1173_p3)
}
0x1689   :  { %874 = dma.vmem_to_hbm [thread:$0]  %s1450_s20, 128, %s1510_s4, [#allocation11]   ;;  %v736_v35 = vpop.permute.xlu0 %735 }
0x168a   :  { %739 = vst.msk [vmem:[#allocation9 + $0x18] sm:$0xf] %vm162_vm2, %v736_v35  ;;  %s1177_s16 = scalar_lea.vmem %s1454_s22, 512  ;;  %p1182_p5 = scmp.lt.s32.totalorder %s1454_s22, %s1454_s22 }
0x168b   :  { %p1178_p4 = scmp.ne.s32.totalorder %s1454_s22, %s1177_s16  ;;  %p1183_p6 = scmp.lt.s32.totalorder %s1177_s16, %s1177_s16 }
0x168d   :  { %p1184_p7 = por %p1183_p6, %p1182_p5 }
0x168f   :  { %p1185_p8 = pnand %p1184_p7, %p1178_p4 }
0x1691   :  { %1188 = shalt.err (!%p1185_p8)
}
0x1692   :  { %s1189_s19 = scalar_lea.hbm %s1508_s2, 512 }
0x1693   :  { %p1190_p9 = scmp.ne.s32.totalorder %s1508_s2, %s1189_s19  ;;  %p1193_p10 = scmp.lt.u32.totalorder %s1189_s19, %s1508_s2 }
0x1695   :  { %p1195_p11 = pnand %p1193_p10, %p1190_p9 }
0x1697   :  { %1198 = shalt.err (!%p1195_p11)
}
0x1698   :  { %854 = dma.vmem_to_hbm [thread:$0]  %s1454_s22, 512, %s1508_s2, [#allocation6], %s1211_s0, %s1211_s0, %s1212_s13  }
0x1699   :  { %1203 = dma.done.wait [#allocation6], 512  }
0x169a   :  { %1204 = vsyncadd [#allocation6], 4294966784 }
0x169b   :  { %1205 = dma.done.wait [#allocation11], 256  }
0x169c   :  { %1206 = vsyncadd [#allocation11], 4294967040 }
0x169d   :  { %884 = vsyncpa [#allocation5], 1 }
0x169e   :  { %885 = vsyncpa [#allocation8], 1 }
0x169f   :  { %886 = vsyncpa [#allocation6], 1 }
0x16a0   :  { %887 = vsyncpa [#allocation11], 1 }

</bundles_post_ra>
